<compile_context>
chip_gen: v7x
topology: tpu7x:2x2x1
jax: 0.10.0
libtpu: 0.0.40
codegen_flags: <defaults>
</compile_context>

<pallas_src>
import functools

import jax
import jax.numpy as jnp
from jax.experimental import pallas as pl
from jax.experimental.pallas import tpu as pltpu


NBINS = 32  # `desired_precision` in the reference module


# ---------------------------------------------------------------------------
# Plain-JAX prologue (needs global statistics / color-space conversion).
# TODO(synk): fuse into a two-pass Pallas pipeline (pass 1: a*/b* min/max +
# bincounts straight from raw RGB; pass 2: this kernel recomputing l and the
# labels on the fly) so L/a/b and the label planes never round-trip HBM.
# ---------------------------------------------------------------------------
def _rgb_to_lab(rgb):
    """sRGB in [0, 1], shape (..., 3) -> (L, a, b). D65, matches skimage rgb2lab."""
    lin = jnp.where(rgb > 0.04045, ((rgb + 0.055) / 1.055) ** 2.4, rgb / 12.92)
    m = jnp.array([[0.412453, 0.357580, 0.180423],
                   [0.212671, 0.715160, 0.072169],
                   [0.019334, 0.119193, 0.950227]], jnp.float32)
    xyz = lin @ m.T
    white = jnp.array([0.95047, 1.0, 1.08883], jnp.float32)
    t = xyz / white
    f = jnp.where(t > 0.008856, jnp.cbrt(t), 7.787 * t + 16.0 / 116.0)
    fx, fy, fz = f[..., 0], f[..., 1], f[..., 2]
    L = 116.0 * fy - 16.0
    a = 500.0 * (fx - fy)
    b = 200.0 * (fy - fz)
    return L, a, b


def _quantize_channel(ch, nbins):
    """Global min/max quantization + per-bin counts (reference _quantize_channel)."""
    cmin = jnp.min(ch)
    cmax = jnp.max(ch)
    rng = cmax - cmin
    # Guard the degenerate constant-channel case (the reference would NaN here).
    rng = jnp.where(rng == 0.0, 1.0, rng)
    norm = (ch - cmin) / rng
    # PyTorch does (norm * (nbins-1)).long() -> truncation; norm in [0,1] so the
    # clip only protects against fp round-up at the max.
    q = jnp.clip((norm * (nbins - 1)).astype(jnp.int32), 0, nbins - 1)
    counts = jnp.bincount(q.reshape(-1), length=nbins).astype(jnp.float32)
    return q, counts


def _chip_tiling():
    """(max pixel tile, scoped-VMEM limit) for the current TPU generation."""
    try:
        cap = pltpu.get_tpu_info().vmem_capacity_bytes
    except Exception:
        cap = 128 * 1024 * 1024
    if cap <= 64 * 1024 * 1024:
        # v7x-class: 64 MiB physical VMEM per TensorCore. ~600-700 B/px of
        # in-kernel intermediates -> 16384 px (~10 MiB) is safe, 32768 is not.
        return 16384, cap // 2
    # v5e / v6e-class: 128 MiB physical. Allow ~96 MiB scoped so 32768-px tiles
    # fit without spills, keeping headroom for the double-buffered inputs.
    return 32768, min((cap * 3) // 4, 96 * 1024 * 1024)


def _pick_tile(P, max_tile):
    """Largest 128-multiple divisor of P that is <= max_tile, preferring >= 2
    grid steps so the "parallel" grid axis can feed both v7x TensorCores."""
    cap = min(max_tile, P)
    if P >= 256:
        cap = min(cap, P // 2)
    cap -= cap % 128
    cap = max(cap, 128)
    t = cap
    while P % t != 0:
        t -= 128
    return t


# ---------------------------------------------------------------------------
# Fused Pallas kernel: harmonization -> backbone stub -> task head -> weighted
# softmax cross-entropy partial sums, all in the lane-dense (C, P) layout.
# ---------------------------------------------------------------------------
def _colorization_kernel(l_ref, alab_ref, blab_ref, wla_ref, wlb_ref,
                         wh_ref, bh_ref, wbb_ref, bbb_ref, whd_ref, bhd_ref,
                         out_ref, *, nbins):
    l = l_ref[...]                                                  # (1, TP) f32

    # Harmonization 1x1 conv (1 -> 3) + sigmoid: broadcast FMAs on the VPU
    # (K=1 would waste the MXU).
    # TODO(synk): bf16 sigmoid/exp on v6e/v7x once validated vs f32 (v5e has no
    # bf16 VPU/EUP).
    h = jax.nn.sigmoid(wh_ref[...] * l + bh_ref[...])               # (3, TP)

    # Backbone stub: 1x1 conv (3 -> E) + ReLU on the MXU. bf16 operands avoid
    # multi-pass f32 MXU emulation (v6e/v7x); accumulate in f32.
    e = jnp.dot(wbb_ref[...].astype(jnp.bfloat16), h.astype(jnp.bfloat16),
                preferred_element_type=jnp.float32) + bbb_ref[...]
    e = jnp.maximum(e, 0.0)                                         # (E, TP) f32

    # Task head stub: 1x1 conv (E -> 2*nbins) logits on the MXU.
    logits = (jnp.dot(whd_ref[...].astype(jnp.bfloat16), e.astype(jnp.bfloat16),
                      preferred_element_type=jnp.float32)
              + bhd_ref[...])                                       # (2*nbins, TP)

    # Class-index iota, built once per tile and shared by the a*/b* halves.
    cls = jax.lax.broadcasted_iota(jnp.int32, (nbins, l.shape[-1]), 0)

    def weighted_ce_partials(lg, lab, wlab):
        # lg: (nbins, TP) logits; lab: (1, TP) int32; wlab: (1, TP) = w[y_p]
        m = jnp.max(lg, axis=0, keepdims=True)                      # (1, TP)
        lse = m + jnp.log(jnp.sum(jnp.exp(lg - m), axis=0, keepdims=True))
        # Logit at the label straight from the compare mask (no f32 onehot).
        picked = jnp.sum(jnp.where(cls == lab, lg, 0.0), axis=0, keepdims=True)
        num = jnp.sum(wlab * (lse - picked))                        # sum_p w[y_p]*nll_p
        den = jnp.sum(wlab)                                         # sum_p w[y_p]
        return num, den

    a_num, a_den = weighted_ce_partials(logits[:nbins, :], alab_ref[...], wla_ref[...])
    b_num, b_den = weighted_ce_partials(logits[nbins:, :], blab_ref[...], wlb_ref[...])

    # Lane-dense per-tile partials: one private (8, 128) block per grid step,
    # so the grid axis stays fully "parallel" (no carried accumulator).
    row = jax.lax.broadcasted_iota(jnp.int32, (8, 128), 0)
    out = jnp.where(row == 0, a_num, 0.0)
    out = jnp.where(row == 1, a_den, out)
    out = jnp.where(row == 2, b_num, out)
    out = jnp.where(row == 3, b_den, out)
    out_ref[...] = out


def colorization_forward_loss(raw_rgb, params, *, nbins=NBINS, tile=None):
    """raw_rgb: (B, 3, H, W) float RGB in [0, 255] (as the PyTorch module expects).
    Returns the scalar Colorization task loss."""
    B, C, H, W = raw_rgb.shape
    assert C == 3
    P = B * H * W
    assert P % 128 == 0, "flattened pixel count must be a multiple of 128"

    max_tile, vmem_limit = _chip_tiling()
    if tile is None:
        tile = _pick_tile(P, max_tile)
    assert tile % 128 == 0 and P % tile == 0, "tile must be a 128-multiple divisor of P"

    # --- pretreat: rgb -> Lab, L-channel normalization, a*/b* quantization. ---
    rgb = jnp.transpose(raw_rgb.astype(jnp.float32), (0, 2, 3, 1)) / 255.0
    L, a, b = _rgb_to_lab(rgb)
    l_norm = ((L - 50.0) / 100.0).reshape(1, P)                     # lane-dense (1, P)
    a_lab, a_counts = _quantize_channel(a, nbins)
    b_lab, b_counts = _quantize_channel(b, nbins)
    a_lab = a_lab.reshape(1, P)
    b_lab = b_lab.reshape(1, P)

    # generate_loss class weights: balance weights start at ones, += bincounts.
    eps = 1e-5
    a_w = 1.0 / jnp.log(1.0 + a_counts + eps)                       # (nbins,)
    b_w = 1.0 / jnp.log(1.0 + b_counts + eps)
    # Per-pixel gathered class weights (hoists the in-kernel w*onehot reduce,
    # ~25-30% of the saturating VALU work, into the prologue at +8 B/px HBM).
    wlab_a = a_w[a_lab].astype(jnp.float32)                         # (1, P)
    wlab_b = b_w[b_lab].astype(jnp.float32)                         # (1, P)

    wh, bh, wbb, bbb, whd, bhd = params
    num_tiles = P // tile

    pix_spec = pl.BlockSpec((1, tile), lambda i: (0, i))
    full = lambda arr: pl.BlockSpec(arr.shape, lambda i: (0, 0))

    kernel = functools.partial(_colorization_kernel, nbins=nbins)

    partials = pl.pallas_call(
        kernel,
        out_shape=jax.ShapeDtypeStruct((num_tiles * 8, 128), jnp.float32),
        grid_spec=pltpu.PrefetchScalarGridSpec(
            num_scalar_prefetch=0,
            grid=(num_tiles,),
            in_specs=[
                pix_spec,                    # l (normalized L channel)
                pix_spec,                    # a* labels (int32)
                pix_spec,                    # b* labels (int32)
                pix_spec,                    # per-pixel a* class weight
                pix_spec,                    # per-pixel b* class weight
                full(wh), full(bh),          # harmonization 1x1 conv
                full(wbb), full(bbb),        # backbone stub 1x1 conv
                full(whd), full(bhd),        # task head 1x1 conv
            ],
            out_specs=pl.BlockSpec((8, 128), lambda i: (i, 0)),
        ),
        compiler_params=pltpu.CompilerParams(
            dimension_semantics=("parallel",),
            vmem_limit_bytes=vmem_limit),
    )(l_norm, a_lab, b_lab, wlab_a, wlab_b, wh, bh, wbb, bbb, whd, bhd)

    # Tiny epilogue in JAX: sum per-tile partials, form the two weighted means.
    parts = partials.reshape(num_tiles, 8, 128)
    a_num = jnp.sum(parts[:, 0, 0])
    a_den = jnp.sum(parts[:, 1, 0])
    b_num = jnp.sum(parts[:, 2, 0])
    b_den = jnp.sum(parts[:, 3, 0])
    a_loss = a_num / a_den
    b_loss = b_num / b_den
    return (a_loss + b_loss) / 2.0


def init_params(key, embed_features=32, nbins=NBINS):
    ks = jax.random.split(key, 6)
    wh = jax.random.normal(ks[0], (3, 1), jnp.float32) * 0.5                 # 1x1 conv 1->3
    bh = jax.random.normal(ks[1], (3, 1), jnp.float32) * 0.1
    wbb = jax.random.normal(ks[2], (embed_features, 3), jnp.float32) * 0.2   # backbone stub
    bbb = jax.random.normal(ks[3], (embed_features, 1), jnp.float32) * 0.1
    whd = jax.random.normal(ks[4], (2 * nbins, embed_features), jnp.float32) * 0.2  # task head
    bhd = jax.random.normal(ks[5], (2 * nbins, 1), jnp.float32) * 0.1
    return (wh, bh, wbb, bbb, whd, bhd)


if __name__ == "__main__":
    key = jax.random.PRNGKey(0)
    k_img, k_par = jax.random.split(key)

    B, C, H, W = 2, 3, 16, 16        # P = 512 flattened pixels
    embed_features = 32

    # raw RGB images in [0, 255], NCHW like the PyTorch module expects
    raw = jax.random.uniform(k_img, (B, C, H, W), jnp.float32) * 255.0
    params = init_params(k_par, embed_features)

    loss = colorization_forward_loss(raw, params)   # auto tile -> 2 grid steps here
    jax.block_until_ready(loss)
    print("KERNEL_OK")
</pallas_src>

<mosaic_0001>
module attributes {stable_mosaic.version = 11 : i64} {
  func.func @_colorization_kernel(%arg0: i32, %arg1: memref<1x256xf32, #tpu.memory_space<vmem>>, %arg2: memref<1x256xi32, #tpu.memory_space<vmem>>, %arg3: memref<1x256xi32, #tpu.memory_space<vmem>>, %arg4: memref<1x256xf32, #tpu.memory_space<vmem>>, %arg5: memref<1x256xf32, #tpu.memory_space<vmem>>, %arg6: memref<3x1xf32, #tpu.memory_space<vmem>>, %arg7: memref<3x1xf32, #tpu.memory_space<vmem>>, %arg8: memref<32x3xf32, #tpu.memory_space<vmem>>, %arg9: memref<32x1xf32, #tpu.memory_space<vmem>>, %arg10: memref<64x32xf32, #tpu.memory_space<vmem>>, %arg11: memref<64x1xf32, #tpu.memory_space<vmem>>, %arg12: memref<8x128xf32, #tpu.memory_space<vmem>>) attributes {dimension_semantics = [#tpu.dimension_semantics<parallel>], iteration_bounds = array<i64: 2>, scalar_prefetch = 0 : i64, scratch_operands = 0 : i64, tpu.core_type = #tpu.core_type<tc>, window_params = [{transform_indices = @transform_0, window_bounds = array<i64: 1, 256>}, {transform_indices = @transform_1, window_bounds = array<i64: 1, 256>}, {transform_indices = @transform_2, window_bounds = array<i64: 1, 256>}, {transform_indices = @transform_3, window_bounds = array<i64: 1, 256>}, {transform_indices = @transform_4, window_bounds = array<i64: 1, 256>}, {pipeline_mode = #tpu.pipeline_mode<synchronous>, transform_indices = @transform_5, window_bounds = array<i64: 3, 1>}, {pipeline_mode = #tpu.pipeline_mode<synchronous>, transform_indices = @transform_6, window_bounds = array<i64: 3, 1>}, {pipeline_mode = #tpu.pipeline_mode<synchronous>, transform_indices = @transform_7, window_bounds = array<i64: 32, 3>}, {pipeline_mode = #tpu.pipeline_mode<synchronous>, transform_indices = @transform_8, window_bounds = array<i64: 32, 1>}, {pipeline_mode = #tpu.pipeline_mode<synchronous>, transform_indices = @transform_9, window_bounds = array<i64: 64, 32>}, {pipeline_mode = #tpu.pipeline_mode<synchronous>, transform_indices = @transform_10, window_bounds = array<i64: 64, 1>}, {transform_indices = @transform_11, window_bounds = array<i64: 8, 128>}]} {
    %c0 = arith.constant 0 : index
    %c0_0 = arith.constant 0 : index
    %0 = vector.load %arg1[%c0, %c0_0] : memref<1x256xf32, #tpu.memory_space<vmem>>, vector<1x256xf32>
    %c0_1 = arith.constant 0 : index
    %c0_2 = arith.constant 0 : index
    %1 = vector.load %arg6[%c0_1, %c0_2] : memref<3x1xf32, #tpu.memory_space<vmem>>, vector<3x1xf32>
    %2 = vector.broadcast %1 : vector<3x1xf32> to vector<3x256xf32>
    %3 = vector.broadcast %0 : vector<1x256xf32> to vector<3x256xf32>
    %4 = arith.mulf %2, %3 : vector<3x256xf32>
    %c0_3 = arith.constant 0 : index
    %c0_4 = arith.constant 0 : index
    %5 = vector.load %arg7[%c0_3, %c0_4] : memref<3x1xf32, #tpu.memory_space<vmem>>, vector<3x1xf32>
    %6 = vector.broadcast %5 : vector<3x1xf32> to vector<3x256xf32>
    %7 = arith.addf %4, %6 : vector<3x256xf32>
    %8 = arith.negf %7 : vector<3x256xf32>
    %9 = math.exp %8 : vector<3x256xf32>
    %cst = arith.constant 1.000000e+00 : f32
    %10 = vector.broadcast %cst : f32 to vector<3x256xf32>
    %11 = arith.addf %10, %9 : vector<3x256xf32>
    %12 = arith.divf %10, %11 : vector<3x256xf32>
    %c0_5 = arith.constant 0 : index
    %c0_6 = arith.constant 0 : index
    %13 = vector.load %arg8[%c0_5, %c0_6] : memref<32x3xf32, #tpu.memory_space<vmem>>, vector<32x3xf32>
    %14 = arith.truncf %13 : vector<32x3xf32> to vector<32x3xbf16>
    %15 = arith.truncf %12 : vector<3x256xf32> to vector<3x256xbf16>
    %cst_7 = arith.constant dense<0.000000e+00> : vector<32x256xf32>
    %16 = tpu.matmul %14, %15, %cst_7 {dimension_numbers = #tpu.dot_dimension_numbers<[1], [0], [0], [1], [0, 0, 1, 1], [], []>} : vector<32x3xbf16>, vector<3x256xbf16>, vector<32x256xf32> -> vector<32x256xf32>
    %c0_8 = arith.constant 0 : index
    %c0_9 = arith.constant 0 : index
    %17 = vector.load %arg9[%c0_8, %c0_9] : memref<32x1xf32, #tpu.memory_space<vmem>>, vector<32x1xf32>
    %18 = vector.broadcast %17 : vector<32x1xf32> to vector<32x256xf32>
    %19 = arith.addf %16, %18 : vector<32x256xf32>
    %cst_10 = arith.constant 0.000000e+00 : f32
    %20 = vector.broadcast %cst_10 : f32 to vector<32x256xf32>
    %21 = arith.maximumf %19, %20 : vector<32x256xf32>
    %c0_11 = arith.constant 0 : index
    %c0_12 = arith.constant 0 : index
    %22 = vector.load %arg10[%c0_11, %c0_12] : memref<64x32xf32, #tpu.memory_space<vmem>>, vector<64x32xf32>
    %23 = arith.truncf %22 : vector<64x32xf32> to vector<64x32xbf16>
    %24 = arith.truncf %21 : vector<32x256xf32> to vector<32x256xbf16>
    %cst_13 = arith.constant dense<0.000000e+00> : vector<64x256xf32>
    %25 = tpu.matmul %23, %24, %cst_13 {dimension_numbers = #tpu.dot_dimension_numbers<[1], [0], [0], [1], [0, 0, 1, 1], [], []>} : vector<64x32xbf16>, vector<32x256xbf16>, vector<64x256xf32> -> vector<64x256xf32>
    %c0_14 = arith.constant 0 : index
    %c0_15 = arith.constant 0 : index
    %26 = vector.load %arg11[%c0_14, %c0_15] : memref<64x1xf32, #tpu.memory_space<vmem>>, vector<64x1xf32>
    %27 = vector.broadcast %26 : vector<64x1xf32> to vector<64x256xf32>
    %28 = arith.addf %25, %27 : vector<64x256xf32>
    %29 = tpu.iota {dimensions = array<i32: 0>} : vector<32x256xi32>
    %30 = vector.extract_strided_slice %28 {offsets = [0, 0], sizes = [32, 256], strides = [1, 1]} : vector<64x256xf32> to vector<32x256xf32>
    %c0_16 = arith.constant 0 : index
    %c0_17 = arith.constant 0 : index
    %31 = vector.load %arg2[%c0_16, %c0_17] : memref<1x256xi32, #tpu.memory_space<vmem>>, vector<1x256xi32>
    %c0_18 = arith.constant 0 : index
    %c0_19 = arith.constant 0 : index
    %32 = vector.load %arg4[%c0_18, %c0_19] : memref<1x256xf32, #tpu.memory_space<vmem>>, vector<1x256xf32>
    %cst_20 = arith.constant dense<0xFF800000> : vector<256xf32>
    %33 = vector.multi_reduction <maximumf>, %30, %cst_20 [0] : vector<32x256xf32> to vector<256xf32>
    %34 = vector.shape_cast %33 : vector<256xf32> to vector<1x256xf32>
    %35 = vector.broadcast %34 : vector<1x256xf32> to vector<32x256xf32>
    %36 = arith.subf %30, %35 : vector<32x256xf32>
    %37 = math.exp %36 : vector<32x256xf32>
    %cst_21 = arith.constant dense<0.000000e+00> : vector<256xf32>
    %38 = vector.multi_reduction <add>, %37, %cst_21 [0] : vector<32x256xf32> to vector<256xf32>
    %39 = vector.shape_cast %38 : vector<256xf32> to vector<1x256xf32>
    %40 = math.log %39 : vector<1x256xf32>
    %41 = arith.addf %34, %40 : vector<1x256xf32>
    %42 = vector.broadcast %31 : vector<1x256xi32> to vector<32x256xi32>
    %43 = arith.cmpi eq, %29, %42 : vector<32x256xi32>
    %cst_22 = arith.constant 0.000000e+00 : f32
    %44 = vector.broadcast %cst_22 : f32 to vector<32x256xf32>
    %45 = arith.select %43, %30, %44 : vector<32x256xi1>, vector<32x256xf32>
    %cst_23 = arith.constant dense<0.000000e+00> : vector<256xf32>
    %46 = vector.multi_reduction <add>, %45, %cst_23 [0] : vector<32x256xf32> to vector<256xf32>
    %47 = vector.shape_cast %46 : vector<256xf32> to vector<1x256xf32>
    %48 = arith.subf %41, %47 : vector<1x256xf32>
    %49 = arith.mulf %32, %48 : vector<1x256xf32>
    %50 = vector.shape_cast %49 : vector<1x256xf32> to vector<1x1x256xf32>
    %cst_24 = arith.constant dense<0.000000e+00> : vector<1xf32>
    %51 = vector.multi_reduction <add>, %50, %cst_24 [1, 2] : vector<1x1x256xf32> to vector<1xf32>
    %52 = vector.shape_cast %51 : vector<1xf32> to vector<1x1x1xf32>
    %53 = vector.extract %52[0, 0, 0] : f32 from vector<1x1x1xf32>
    %54 = vector.shape_cast %32 : vector<1x256xf32> to vector<1x1x256xf32>
    %cst_25 = arith.constant dense<0.000000e+00> : vector<1xf32>
    %55 = vector.multi_reduction <add>, %54, %cst_25 [1, 2] : vector<1x1x256xf32> to vector<1xf32>
    %56 = vector.shape_cast %55 : vector<1xf32> to vector<1x1x1xf32>
    %57 = vector.extract %56[0, 0, 0] : f32 from vector<1x1x1xf32>
    %58 = vector.extract_strided_slice %28 {offsets = [32, 0], sizes = [32, 256], strides = [1, 1]} : vector<64x256xf32> to vector<32x256xf32>
    %c0_26 = arith.constant 0 : index
    %c0_27 = arith.constant 0 : index
    %59 = vector.load %arg3[%c0_26, %c0_27] : memref<1x256xi32, #tpu.memory_space<vmem>>, vector<1x256xi32>
    %c0_28 = arith.constant 0 : index
    %c0_29 = arith.constant 0 : index
    %60 = vector.load %arg5[%c0_28, %c0_29] : memref<1x256xf32, #tpu.memory_space<vmem>>, vector<1x256xf32>
    %cst_30 = arith.constant dense<0xFF800000> : vector<256xf32>
    %61 = vector.multi_reduction <maximumf>, %58, %cst_30 [0] : vector<32x256xf32> to vector<256xf32>
    %62 = vector.shape_cast %61 : vector<256xf32> to vector<1x256xf32>
    %63 = vector.broadcast %62 : vector<1x256xf32> to vector<32x256xf32>
    %64 = arith.subf %58, %63 : vector<32x256xf32>
    %65 = math.exp %64 : vector<32x256xf32>
    %cst_31 = arith.constant dense<0.000000e+00> : vector<256xf32>
    %66 = vector.multi_reduction <add>, %65, %cst_31 [0] : vector<32x256xf32> to vector<256xf32>
    %67 = vector.shape_cast %66 : vector<256xf32> to vector<1x256xf32>
    %68 = math.log %67 : vector<1x256xf32>
    %69 = arith.addf %62, %68 : vector<1x256xf32>
    %70 = vector.broadcast %59 : vector<1x256xi32> to vector<32x256xi32>
    %71 = arith.cmpi eq, %29, %70 : vector<32x256xi32>
    %cst_32 = arith.constant 0.000000e+00 : f32
    %72 = vector.broadcast %cst_32 : f32 to vector<32x256xf32>
    %73 = arith.select %71, %58, %72 : vector<32x256xi1>, vector<32x256xf32>
    %cst_33 = arith.constant dense<0.000000e+00> : vector<256xf32>
    %74 = vector.multi_reduction <add>, %73, %cst_33 [0] : vector<32x256xf32> to vector<256xf32>
    %75 = vector.shape_cast %74 : vector<256xf32> to vector<1x256xf32>
    %76 = arith.subf %69, %75 : vector<1x256xf32>
    %77 = arith.mulf %60, %76 : vector<1x256xf32>
    %78 = vector.shape_cast %77 : vector<1x256xf32> to vector<1x1x256xf32>
    %cst_34 = arith.constant dense<0.000000e+00> : vector<1xf32>
    %79 = vector.multi_reduction <add>, %78, %cst_34 [1, 2] : vector<1x1x256xf32> to vector<1xf32>
    %80 = vector.shape_cast %79 : vector<1xf32> to vector<1x1x1xf32>
    %81 = vector.extract %80[0, 0, 0] : f32 from vector<1x1x1xf32>
    %82 = vector.shape_cast %60 : vector<1x256xf32> to vector<1x1x256xf32>
    %cst_35 = arith.constant dense<0.000000e+00> : vector<1xf32>
    %83 = vector.multi_reduction <add>, %82, %cst_35 [1, 2] : vector<1x1x256xf32> to vector<1xf32>
    %84 = vector.shape_cast %83 : vector<1xf32> to vector<1x1x1xf32>
    %85 = vector.extract %84[0, 0, 0] : f32 from vector<1x1x1xf32>
    %86 = tpu.iota {dimensions = array<i32: 0>} : vector<8x128xi32>
    %c0_i32 = arith.constant 0 : i32
    %87 = vector.broadcast %c0_i32 : i32 to vector<8x128xi32>
    %88 = arith.cmpi eq, %86, %87 : vector<8x128xi32>
    %cst_36 = arith.constant 0.000000e+00 : f32
    %89 = vector.broadcast %53 : f32 to vector<8x128xf32>
    %90 = vector.broadcast %cst_36 : f32 to vector<8x128xf32>
    %91 = arith.select %88, %89, %90 : vector<8x128xi1>, vector<8x128xf32>
    %c1_i32 = arith.constant 1 : i32
    %92 = vector.broadcast %c1_i32 : i32 to vector<8x128xi32>
    %93 = arith.cmpi eq, %86, %92 : vector<8x128xi32>
    %94 = vector.broadcast %57 : f32 to vector<8x128xf32>
    %95 = arith.select %93, %94, %91 : vector<8x128xi1>, vector<8x128xf32>
    %c2_i32 = arith.constant 2 : i32
    %96 = vector.broadcast %c2_i32 : i32 to vector<8x128xi32>
    %97 = arith.cmpi eq, %86, %96 : vector<8x128xi32>
    %98 = vector.broadcast %81 : f32 to vector<8x128xf32>
    %99 = arith.select %97, %98, %95 : vector<8x128xi1>, vector<8x128xf32>
    %c3_i32 = arith.constant 3 : i32
    %100 = vector.broadcast %c3_i32 : i32 to vector<8x128xi32>
    %101 = arith.cmpi eq, %86, %100 : vector<8x128xi32>
    %102 = vector.broadcast %85 : f32 to vector<8x128xf32>
    %103 = arith.select %101, %102, %99 : vector<8x128xi1>, vector<8x128xf32>
    %c0_37 = arith.constant 0 : index
    %c0_38 = arith.constant 0 : index
    %104 = vector.load %arg12[%c0_37, %c0_38] : memref<8x128xf32, #tpu.memory_space<vmem>>, vector<8x128xf32>
    tpu.vector_store %arg12[%c0_37, %c0_38], %103 {strides = array<i32>} : memref<8x128xf32, #tpu.memory_space<vmem>>, vector<8x128xf32>,
    return
  }
  func.func @transform_0(%arg0: i32) -> (i32, i32) {
    %c0_i32 = arith.constant 0 : i32
    %c0_i32_0 = arith.constant 0 : i32
    return %c0_i32, %arg0 : i32, i32
  }
  func.func @transform_1(%arg0: i32) -> (i32, i32) {
    %c0_i32 = arith.constant 0 : i32
    %c0_i32_0 = arith.constant 0 : i32
    return %c0_i32, %arg0 : i32, i32
  }
  func.func @transform_2(%arg0: i32) -> (i32, i32) {
    %c0_i32 = arith.constant 0 : i32
    %c0_i32_0 = arith.constant 0 : i32
    return %c0_i32, %arg0 : i32, i32
  }
  func.func @transform_3(%arg0: i32) -> (i32, i32) {
    %c0_i32 = arith.constant 0 : i32
    %c0_i32_0 = arith.constant 0 : i32
    return %c0_i32, %arg0 : i32, i32
  }
  func.func @transform_4(%arg0: i32) -> (i32, i32) {
    %c0_i32 = arith.constant 0 : i32
    %c0_i32_0 = arith.constant 0 : i32
    return %c0_i32, %arg0 : i32, i32
  }
  func.func @transform_5(%arg0: i32) -> (i32, i32) {
    %c0_i32 = arith.constant 0 : i32
    %c0_i32_0 = arith.constant 0 : i32
    %c0_i32_1 = arith.constant 0 : i32
    return %c0_i32, %c0_i32_0 : i32, i32
  }
  func.func @transform_6(%arg0: i32) -> (i32, i32) {
    %c0_i32 = arith.constant 0 : i32
    %c0_i32_0 = arith.constant 0 : i32
    %c0_i32_1 = arith.constant 0 : i32
    return %c0_i32, %c0_i32_0 : i32, i32
  }
  func.func @transform_7(%arg0: i32) -> (i32, i32) {
    %c0_i32 = arith.constant 0 : i32
    %c0_i32_0 = arith.constant 0 : i32
    %c0_i32_1 = arith.constant 0 : i32
    return %c0_i32, %c0_i32_0 : i32, i32
  }
  func.func @transform_8(%arg0: i32) -> (i32, i32) {
    %c0_i32 = arith.constant 0 : i32
    %c0_i32_0 = arith.constant 0 : i32
    %c0_i32_1 = arith.constant 0 : i32
    return %c0_i32, %c0_i32_0 : i32, i32
  }
  func.func @transform_9(%arg0: i32) -> (i32, i32) {
    %c0_i32 = arith.constant 0 : i32
    %c0_i32_0 = arith.constant 0 : i32
    %c0_i32_1 = arith.constant 0 : i32
    return %c0_i32, %c0_i32_0 : i32, i32
  }
  func.func @transform_10(%arg0: i32) -> (i32, i32) {
    %c0_i32 = arith.constant 0 : i32
    %c0_i32_0 = arith.constant 0 : i32
    %c0_i32_1 = arith.constant 0 : i32
    return %c0_i32, %c0_i32_0 : i32, i32
  }
  func.func @transform_11(%arg0: i32) -> (i32, i32) {
    %c0_i32 = arith.constant 0 : i32
    %c0_i32_0 = arith.constant 0 : i32
    return %arg0, %c0_i32 : i32, i32
  }
}

</mosaic_0001>

<bundles_post_ra>
// kernel: tpu_custom_call.1
= control target key start
LH: loop header
LB: loop body
LE: loop exit
PB: predicated region body
PF: predicated region fallthrough
CT: control target
= control target key end

     0   :  { %s2975_s0 = inlined_call_operand.hbm [shape: f32[1,512], index: 0, kind: input, shape index: {}]   ;;  %s2976_s1 = inlined_call_operand.hbm [shape: s32[1,512], index: 1, kind: input, shape index: {}]   ;;  %s2977_s2 = inlined_call_operand.hbm [shape: s32[1,512], index: 2, kind: input, shape index: {}]   ;;  %s2978_s3 = inlined_call_operand.hbm [shape: f32[1,512], index: 3, kind: input, shape index: {}]   ;;  %s2979_s4 = inlined_call_operand.hbm [shape: f32[1,512], index: 4, kind: input, shape index: {}]   ;;  %s2980_s5 = inlined_call_operand.hbm [shape: f32[3,1], index: 5, kind: input, shape index: {}]   ;;  %s2981_s6 = inlined_call_operand.hbm [shape: f32[3,1], index: 6, kind: input, shape index: {}]   ;;  %s2982_s7 = inlined_call_operand.hbm [shape: f32[32,3], index: 7, kind: input, shape index: {}]   ;;  %s2983_s8 = inlined_call_operand.hbm [shape: f32[32,1], index: 8, kind: input, shape index: {}]   ;;  %s2984_s9 = inlined_call_operand.hbm [shape: f32[64,32], index: 9, kind: input, shape index: {}]   ;;  %s2985_s10 = inlined_call_operand.hbm [shape: f32[64,1], index: 10, kind: input, shape index: {}]   ;;  %s2986_s11 = inlined_call_operand.hbm [shape: f32[16,128], index: 11, kind: output, shape index: {}]  }
   0x1   :  { %3016 = sst [smem:[#allocation35_spill]] %s2976_s1 }
   0x2   :  { %3017 = sst [smem:[#allocation36_spill]] %s2978_s3 }
   0x3   :  { %3018 = sst [smem:[#allocation37_spill]] %s2980_s5 }
   0x4   :  { %3019 = sst [smem:[#allocation38_spill]] %s2982_s7 }
   0x5   :  { %3020 = sst [smem:[#allocation39_spill]] %s2984_s9 }
   0x6   :  { %3021 = sst [smem:[#allocation40_spill]] %s2986_s11 }
   0x7   :  { %16 = vsyncpa [#allocation3], 0 }
   0x8   :  { %18 = vsyncpa [#allocation3 + $0x1], 0 }
   0x9   :  { %19 = vsyncpa [#allocation6], 0 }
   0xa   :  { %21 = vsyncpa [#allocation6 + $0x1], 0 }
   0xb   :  { %22 = vsyncpa [#allocation9], 0 }
   0xc   :  { %24 = vsyncpa [#allocation9 + $0x1], 0 }
   0xd   :  { %25 = vsyncpa [#allocation12], 0 }
   0xe   :  { %26 = vsyncpa [#allocation15], 0 }
   0xf   :  { %27 = vsyncpa [#allocation18], 0 }
  0x10   :  { %28 = vsyncpa [#allocation4], 0 }
  0x11   :  { %30 = vsyncpa [#allocation4 + $0x1], 0  ;;  %s2268_s17 = smov 0   ;;  %s2270_s18 = smov 0  }
  0x12   :  { %s2272_s19 = smov 0   ;;  %s2274_s20 = smov 0  }
  0x13 LB: > { %3022 = sst [smem:[#allocation28_spill]] %s2177_s17  ;;  %s2191_s21 = smov [#allocation11]   ;;  %s2189_s20 = sphi %s2274_s20, %s3070_s20   ;;  %s2185_s19 = sphi %s2272_s19, %s3074_s19   ;;  %s2181_s18 = sphi %s2270_s18, %s3073_s18   ;;  %s2177_s17 = sphi %s2268_s17, %s3072_s17  }
  0x14   : > { %s336_s22 = sshll.u32 %s2191_s21, 4  ;;  %s2289_s23 = sadd.s32 4294967295, %s2189_s20   ;;  %s337_s22 = int_to_ptr.vmem [resolvable:$true] %s336_s22 }
  0x15   : > { %3023 = sst [smem:[#allocation29_spill]] %s2289_s23  ;;  %p1538_p0 = scmp.ge.s32.totalorder %s2189_s20, 1 }
  0x16   : > { %p2987_p1 = scmp.eq.s32.totalorder %s2289_s23, 0  ;;  %p323_p2 = scmp.lt.s32.totalorder %s2189_s20, 3 }
  0x17   : > { %s2192_s25 = smov [#allocation14]   ;;  %s2193_s28 = smov [#allocation17]  }
  0x18   : > { %p2294_p3 = pnand %p1538_p0, %p323_p2  ;;  %s357_s26 = sshll.u32 %s2192_s25, 4  ;;  %s2301_s26 = int_to_ptr.vmem [resolvable:$true] %s357_s26 }
  0x19   : > { %s383_s29 = sshll.u32 %s2193_s28, 4  ;;  %s3026_s5 = sld [smem:[#allocation37_spill]]  ;;  %s2309_s29 = int_to_ptr.vmem [resolvable:$true] %s383_s29 }
  0x1a   : > { %s3024_s24 = scalar_select %p2294_p3, 1, 0 }
  0x1b   : > { %p1639_p5 = pneg %p2294_p3 }
  0x1d   : > { %p2305_p6 = pnand %p1639_p5, %p2987_p1 }
  0x1f   : > { %s3025_s27 = scalar_select %p2305_p6, 1, 0 }
  0x20   : > { %s1785_s13 = scalar_lea.hbm %s3026_s5, 64  ;;  %p2319_p8 = pneg %p2305_p6 }
  0x21   : > { %p1786_p7 = scmp.ne.s32.totalorder %s3026_s5, %s1785_s13  ;;  %p1792_p11 = scmp.lt.u32.totalorder %s1785_s13, %s3026_s5 }
  0x22   : > { %s3027_s16 = scalar_select %p2319_p8, 1, 0 }
  0x23   : > { %p1788_p9 = pnand %p2319_p8, %p1786_p7 }
  0x25   : > { %p1789_p10 = pneg %p1788_p9 }
  0x27   : > { %p1794_p12 = pnand %p1792_p11, %p1789_p10 }
  0x29   : > { %1797 = shalt.err (!%p1794_p12)
}
  0x2a   : > { %s1798_s28 = scalar_lea.vmem %s337_s22, 64  ;;  %p1806_p5 = scmp.lt.s32.totalorder %s337_s22, %s337_s22 }
  0x2b   : > { %p1799_p13 = scmp.ne.s32.totalorder %s337_s22, %s1798_s28  ;;  %p1807_p4 = scmp.lt.s32.totalorder %s1798_s28, %s1798_s28 }
  0x2d   : > { %p1801_p0 = pnand %p1799_p13, %p2319_p8  ;;  %p1808_p1 = por %p1807_p4, %p1806_p5 }
  0x2f   : > { %p1802_p2 = pneg %p1801_p0 }
  0x31   : > { %p1809_p3 = pnand %p1808_p1, %p1802_p2 }
  0x33   : > { %1812 = shalt.err (!%p1809_p3)
}
  0x34   : > { %1642 = dma.hbm_to_vmem [thread:$0]  (!%p2305_p6), %s3026_s5, 64, %s337_s22, [#allocation12]  }
  0x35   : > { %s3028_s7 = sld [smem:[#allocation38_spill]] }
  0x3b   : > { %s1813_s15 = scalar_lea.hbm %s3028_s7, 512 }
  0x3c   : > { %p1814_p7 = scmp.ne.s32.totalorder %s3028_s7, %s1813_s15  ;;  %p1820_p1 = scmp.lt.u32.totalorder %s1813_s15, %s3028_s7 }
  0x3e   : > { %p1816_p9 = pnand %p1814_p7, %p2319_p8 }
  0x40   : > { %p1817_p4 = pneg %p1816_p9 }
  0x42   : > { %p1822_p3 = pnand %p1820_p1, %p1817_p4 }
  0x44   : > { %1825 = shalt.err (!%p1822_p3)
}
  0x45   : > { %s1826_s22 = scalar_lea.vmem %s2301_s26, 512  ;;  %p1834_p13 = scmp.lt.s32.totalorder %s2301_s26, %s2301_s26 }
  0x46   : > { %p1827_p10 = scmp.ne.s32.totalorder %s2301_s26, %s1826_s22  ;;  %p1835_p0 = scmp.lt.s32.totalorder %s1826_s22, %s1826_s22 }
  0x48   : > { %p1829_p11 = pnand %p1827_p10, %p2319_p8  ;;  %p1836_p2 = por %p1835_p0, %p1834_p13 }
  0x4a   : > { %p1830_p12 = pneg %p1829_p11 }
  0x4c   : > { %p1837_p5 = pnand %p1836_p2, %p1830_p12 }
  0x4e   : > { %1840 = shalt.err (!%p1837_p5)
}
  0x4f   : > { %s2990_s30 = smov 128   ;;  %s2992_s11 = smov 8  }
  0x50   : > { %1648 = dma.hbm_to_vmem [thread:$0]  (!%p2305_p6), %s3028_s7, 512, %s2301_s26, [#allocation15], %s2990_s30, %s2990_s30, %s2992_s11  }
  0x51   : > { %s3029_s9 = sld [smem:[#allocation39_spill]] }
  0x57   : > { %s1841_s21 = scalar_lea.hbm %s3029_s9, 1024 }
  0x58   : > { %p1842_p7 = scmp.ne.s32.totalorder %s3029_s9, %s1841_s21  ;;  %p1848_p1 = scmp.lt.u32.totalorder %s1841_s21, %s3029_s9 }
  0x5a   : > { %p1844_p9 = pnand %p1842_p7, %p2319_p8 }
  0x5c   : > { %p1845_p4 = pneg %p1844_p9 }
  0x5e   : > { %p1850_p3 = pnand %p1848_p1, %p1845_p4 }
  0x60   : > { %1853 = shalt.err (!%p1850_p3)
}
  0x61   : > { %s1854_s26 = scalar_lea.vmem %s2309_s29, 1024  ;;  %p1862_p13 = scmp.lt.s32.totalorder %s2309_s29, %s2309_s29 }
  0x62   : > { %p1855_p10 = scmp.ne.s32.totalorder %s2309_s29, %s1854_s26  ;;  %p1863_p0 = scmp.lt.s32.totalorder %s1854_s26, %s1854_s26 }
  0x64   : > { %p1857_p11 = pnand %p1855_p10, %p2319_p8  ;;  %p1864_p2 = por %p1863_p0, %p1862_p13 }
  0x66   : > { %p1858_p12 = pneg %p1857_p11 }
  0x68   : > { %p1865_p5 = pnand %p1864_p2, %p1858_p12 }
  0x6a   : > { %1868 = shalt.err (!%p1865_p5)
}
  0x6b   : > { %1654 = dma.hbm_to_vmem [thread:$0]  (!%p2305_p6), %s3029_s9, 1024, %s2309_s29, [#allocation18], %s2990_s30, %s2990_s30, %s2992_s11  }
  0x6c   : > { %s1537_s13 = sadd.s32 4294967294, %s2189_s20   ;;  %s2389_s14 = sadd.s32 1, %s2189_s20  }
  0x6d   : > { %3030 = sst [smem:[#allocation30_spill]] %s2389_s14  ;;  %s43_s15 = sadd.s32 1, %s2185_s19 }
  0x6e   : > { %s40_s21 = ssub.s32 %s2189_s20, %s2389_s14  ;;  %p50_p7 = scmp.ne.s32.totalorder %s2185_s19, %s2181_s18 }
  0x6f   : > { %p41_p9 = scmp.eq.s32.totalorder %s40_s21, 0  ;;  %p51_p4 = scmp.eq.s32.totalorder %s2189_s20, 0 }
  0x70   : > { %p56_p1 = scmp.ne.s32.totalorder %s2181_s18, %s2177_s17  ;;  %p310_p3 = scmp.eq.s32.totalorder %s2289_s23, 1 }
  0x71   : > { %s2401_s25 = scalar_select %p41_p9, %s2185_s19, %s43_s15  }
  0x72   : > { %p52_p10 = por %p51_p4, %p50_p7  ;;  %p3032_p11 = scmp.eq.s32.totalorder %s2289_s23, 0 }
  0x73   : > { %3031 = sst [smem:[#allocation31_spill]] %s2401_s25  ;;  %p2409_p13 = por %p310_p3, %p50_p7 }
  0x74   : > { %p2405_p12 = por %p3032_p11, %p56_p1  ;;  %p316_p0 = scmp.eq.s32.totalorder %s1537_s13, 1 }
  0x75   : > { %s3035_s28 = scalar_select %p2409_p13, 1, 0 }
  0x76   : > { %s3033_s29 = scalar_select %p2405_p12, 1, 0 }
  0x77   : > { %3036 = sst [smem:[#allocation33_spill]] %s3035_s28  ;;  %p1684_p2 = scmp.lt.s32.totalorder %s2189_s20, 2 }
  0x78   : > { %3034 = sst [smem:[#allocation32_spill]] %s3033_s29  ;;  %s2994_s22 = sand.u32 1, %s2185_s19  }
  0x79   : > { %p2415_p5 = por %p316_p0, %p56_p1  ;;  %s2421_s5 = sshll.u32 %s2994_s22, 1 }
  0x7a   : > { %s2424_s12 = sshll.u32 %s2189_s20, 5  ;;  %p2426_p9 = pnand %p1684_p2, %p52_p10 }
  0x7b   : > { %s3037_s26 = scalar_select %p2415_p5, 1, 0 }
  0x7c   : > { %s3039_s15 = scalar_select %p2426_p9, 1, 0 }
  0x7d   : > { %3038 = sst [smem:[#allocation34_spill]] %s3037_s26  ;;  %s3000_s21 = sand.u32 1, %s2189_s20  }
  0x7e   : > { %s3040_s1 = sld [smem:[#allocation35_spill]]  ;;  %s433_s22 = scalar_lea.vmem [#allocation5], %s2421_s5 }
  0x7f   : > { %s441_s7 = sshll.u32 %s433_s22, 4  ;;  %s2442_s9 = scalar_lea.sflag [#allocation6], %s3000_s21  ;;  %s2438_s7 = int_to_ptr.vmem [resolvable:$true] %s441_s7 }
  0x80   : > { %p2448_p4 = pneg %p2426_p9 }
  0x82   : > { %s3041_s14 = scalar_select %p2448_p4, 1, 0 }
  0x84   : > { %s2435_s11 = scalar_lea.hbm %s3040_s1, %s2424_s12  ;;  %s1874_s22 = scalar_lea.hbm %s3040_s1, 64 }
  0x85   : > { %s1869_s25 = scalar_lea.hbm %s2435_s11, 32  ;;  %p1875_p10 = scmp.lt.u32.totalorder %s2435_s11, %s3040_s1 }
  0x86   : > { %p1870_p7 = scmp.ne.s32.totalorder %s2435_s11, %s1869_s25  ;;  %p1876_p11 = scmp.lt.u32.totalorder %s1874_s22, %s1869_s25 }
  0x87   : > { %p1878_p2 = scmp.lt.u32.totalorder %s1869_s25, %s2435_s11 }
  0x88   : > { %p1872_p1 = pnand %p2448_p4, %p1870_p7  ;;  %p1877_p0 = por %p1876_p11, %p1875_p10 }
  0x8a   : > { %p1873_p3 = pneg %p1872_p1  ;;  %p1879_p5 = por %p1878_p2, %p1877_p0 }
  0x8c   : > { %p1880_p13 = pnand %p1879_p5, %p1873_p3 }
  0x8e   : > { %1883 = shalt.err (!%p1880_p13)
}
  0x8f   : > { %s1884_s21 = scalar_lea.vmem %s2438_s7, 32  ;;  %s2196_s30 = smov [#allocation5]  }
  0x90   : > { %p1885_p7 = scmp.ne.s32.totalorder %s2438_s7, %s1884_s21  ;;  %s1889_s13 = sshll.u32 %s2196_s30, 4  ;;  %s1890_s13 = int_to_ptr.vmem [resolvable:$false] %s1889_s13 }
  0x91   : > { %s1891_s17 = scalar_lea.vmem %s1890_s13, 64  ;;  %p1892_p6 = scmp.lt.s32.totalorder %s2438_s7, %s1890_s13 }
  0x92   : > { %p1887_p1 = pnand %p1885_p7, %p2448_p4  ;;  %p1893_p8 = scmp.lt.s32.totalorder %s1891_s17, %s1884_s21 }
  0x94   : > { %p1888_p12 = pneg %p1887_p1  ;;  %p1894_p10 = por %p1893_p8, %p1892_p6 }
  0x96   : > { %p1895_p11 = pnand %p1894_p10, %p1888_p12 }
  0x98   : > { %1898 = shalt.err (!%p1895_p11)
}
  0x99   : > { %1664 = dma.hbm_to_vmem [thread:$0]  (!%p2426_p9), %s2435_s11, 32, %s2438_s7, %s2442_s9  }
  0x9a   : > { %s3042_s3 = sld [smem:[#allocation36_spill]]  ;;  %s471_s21 = scalar_lea.vmem [#allocation8], %s2421_s5 }
  0x9b   : > { %s479_s30 = sshll.u32 %s471_s21, 4  ;;  %s2197_s13 = smov [#allocation13]   ;;  %s2479_s30 = int_to_ptr.vmem [resolvable:$true] %s479_s30 }
  0x9c   : > { %s2481_s17 = sshll.u32 %s2197_s13, 4  ;;  %s3043_s1 = sand.u32 1, %s2189_s20   ;;  %s348_s17 = int_to_ptr.vmem [resolvable:$true] %s2481_s17 }
  0x9d   : > { %s2485_s28 = scalar_lea.sflag [#allocation9], %s3043_s1 }
  0xa0   : > { %s2476_s22 = scalar_lea.hbm %s3042_s3, %s2424_s12  ;;  %s1904_s26 = scalar_lea.hbm %s3042_s3, 64 }
  0xa1   : > { %s1899_s7 = scalar_lea.hbm %s2476_s22, 32  ;;  %p1905_p13 = scmp.lt.u32.totalorder %s2476_s22, %s3042_s3 }
  0xa2   : > { %p1900_p6 = scmp.ne.s32.totalorder %s2476_s22, %s1899_s7  ;;  %p1906_p5 = scmp.lt.u32.totalorder %s1904_s26, %s1899_s7 }
  0xa3   : > { %p1908_p0 = scmp.lt.u32.totalorder %s1899_s7, %s2476_s22 }
  0xa4   : > { %p1902_p8 = pnand %p1900_p6, %p2448_p4  ;;  %p1907_p3 = por %p1906_p5, %p1905_p13 }
  0xa6   : > { %p1903_p12 = pneg %p1902_p8  ;;  %p1909_p2 = por %p1908_p0, %p1907_p3 }
  0xa8   : > { %p1910_p7 = pnand %p1909_p2, %p1903_p12 }
  0xaa   : > { %1913 = shalt.err (!%p1910_p7)
}
  0xab   : > { %s1914_s1 = scalar_lea.vmem %s2479_s30, 32  ;;  %s2198_s21 = smov [#allocation8]  }
  0xac   : > { %p1915_p1 = scmp.ne.s32.totalorder %s2479_s30, %s1914_s1  ;;  %s1919_s13 = sshll.u32 %s2198_s21, 4  ;;  %s1920_s13 = int_to_ptr.vmem [resolvable:$false] %s1919_s13 }
  0xad   : > { %s1921_s23 = scalar_lea.vmem %s1920_s13, 64  ;;  %p1922_p6 = scmp.lt.s32.totalorder %s2479_s30, %s1920_s13 }
  0xae   : > { %p1917_p10 = pnand %p1915_p1, %p2448_p4  ;;  %p1923_p8 = scmp.lt.s32.totalorder %s1921_s23, %s1914_s1 }
  0xb0   : > { %p1918_p11 = pneg %p1917_p10  ;;  %p1924_p13 = por %p1923_p8, %p1922_p6 }
  0xb2   : > { %p1925_p5 = pnand %p1924_p13, %p1918_p11 }
  0xb4   : > { %1928 = shalt.err (!%p1925_p5)
}
  0xb5   : > { %1670 = dma.hbm_to_vmem [thread:$0]  (!%p2426_p9), %s2476_s22, 32, %s2479_s30, %s2485_s28  }
  0xb6   : > { %s1929_s11 = scalar_lea.hbm %s2981_s6, 64  ;;  %p3044_p3 = scmp.ne.s32.totalorder %s3027_s16, 0 }
  0xb7   : > { %p1930_p12 = scmp.ne.s32.totalorder %s2981_s6, %s1929_s11  ;;  %p1936_p7 = scmp.lt.u32.totalorder %s1929_s11, %s2981_s6 }
  0xb9   : > { %p1932_p0 = pnand %p1930_p12, %p3044_p3 }
  0xbb   : > { %p1933_p2 = pneg %p1932_p0 }
  0xbd   : > { %p1938_p1 = pnand %p1936_p7, %p1933_p2 }
  0xbf   : > { %1941 = shalt.err (!%p1938_p1)
}
  0xc0   : > { %s1942_s13 = scalar_lea.vmem %s348_s17, 64  ;;  %p1950_p8 = scmp.lt.s32.totalorder %s348_s17, %s348_s17 }
  0xc1   : > { %p1943_p10 = scmp.ne.s32.totalorder %s348_s17, %s1942_s13  ;;  %p1951_p13 = scmp.lt.s32.totalorder %s1942_s13, %s1942_s13 }
  0xc3   : > { %p1945_p11 = pnand %p1943_p10, %p3044_p3  ;;  %p1952_p5 = por %p1951_p13, %p1950_p8 }
  0xc5   : > { %p1946_p6 = pneg %p1945_p11 }
  0xc7   : > { %p1953_p9 = pnand %p1952_p5, %p1946_p6 }
  0xc9   : > { %1956 = shalt.err (!%p1953_p9)
}
  0xca   : > { %p3045_p12 = scmp.ne.s32.totalorder %s3025_s27, 0  ;;  %s2199_s23 = smov [#allocation16]  }
  0xcb   : > { %s370_s29 = sshll.u32 %s2199_s23, 4  ;;  %s2200_s7 = smov [#allocation19]   ;;  %s371_s29 = int_to_ptr.vmem [resolvable:$true] %s370_s29 }
  0xcc   : > { %1645 = dma.hbm_to_vmem [thread:$0]  (!%p3045_p12), %s2981_s6, 64, %s348_s17, [#allocation12]  }
  0xcd   : > { %s396_s11 = sshll.u32 %s2200_s7, 4  ;;  %s1957_s1 = scalar_lea.hbm %s2983_s8, 512  ;;  %s397_s11 = int_to_ptr.vmem [resolvable:$true] %s396_s11 }
  0xce   : > { %p1958_p9 = scmp.ne.s32.totalorder %s2983_s8, %s1957_s1  ;;  %p1964_p7 = scmp.lt.u32.totalorder %s1957_s1, %s2983_s8 }
  0xd0   : > { %p1960_p0 = pnand %p1958_p9, %p3044_p3 }
  0xd2   : > { %p1961_p2 = pneg %p1960_p0 }
  0xd4   : > { %p1966_p1 = pnand %p1964_p7, %p1961_p2 }
  0xd6   : > { %1969 = shalt.err (!%p1966_p1)
}
  0xd7   : > { %s1970_s17 = scalar_lea.vmem %s371_s29, 512  ;;  %p1978_p8 = scmp.lt.s32.totalorder %s371_s29, %s371_s29 }
  0xd8   : > { %p1971_p10 = scmp.ne.s32.totalorder %s371_s29, %s1970_s17  ;;  %p1979_p13 = scmp.lt.s32.totalorder %s1970_s17, %s1970_s17 }
  0xda   : > { %p1973_p11 = pnand %p1971_p10, %p3044_p3  ;;  %p1980_p5 = por %p1979_p13, %p1978_p8 }
  0xdc   : > { %p1974_p6 = pneg %p1973_p11 }
  0xde   : > { %p1981_p4 = pnand %p1980_p5, %p1974_p6 }
  0xe0   : > { %1984 = shalt.err (!%p1981_p4)
}
  0xe1   : > { %s3046_s30 = smov 8   ;;  %s3047_s23 = smov 128  }
  0xe2   : > { %1651 = dma.hbm_to_vmem [thread:$0]  (!%p3045_p12), %s2983_s8, 512, %s371_s29, [#allocation15], %s3047_s23, %s3047_s23, %s3046_s30  }
  0xe3   : > { %s1985_s1 = scalar_lea.hbm %s2985_s10, 1024 }
  0xe4   : > { %p1986_p9 = scmp.ne.s32.totalorder %s2985_s10, %s1985_s1  ;;  %p1992_p2 = scmp.lt.u32.totalorder %s1985_s1, %s2985_s10 }
  0xe6   : > { %p1988_p4 = pnand %p1986_p9, %p3044_p3 }
  0xe8   : > { %p1989_p0 = pneg %p1988_p4 }
  0xea   : > { %p1994_p7 = pnand %p1992_p2, %p1989_p0 }
  0xec   : > { %1997 = shalt.err (!%p1994_p7)
}
  0xed   : > { %s1998_s3 = scalar_lea.vmem %s397_s11, 1024  ;;  %p2006_p6 = scmp.lt.s32.totalorder %s397_s11, %s397_s11 }
  0xee   : > { %p1999_p1 = scmp.ne.s32.totalorder %s397_s11, %s1998_s3  ;;  %p2007_p8 = scmp.lt.s32.totalorder %s1998_s3, %s1998_s3 }
  0xf0   : > { %p2001_p10 = pnand %p1999_p1, %p3044_p3  ;;  %p2008_p13 = por %p2007_p8, %p2006_p6 }
  0xf2   : > { %p2002_p11 = pneg %p2001_p10 }
  0xf4   : > { %p2009_p5 = pnand %p2008_p13, %p2002_p11 }
  0xf6   : > { %2012 = shalt.err (!%p2009_p5)
}
  0xf7   : > { %1657 = dma.hbm_to_vmem [thread:$0]  (!%p3045_p12), %s2985_s10, 1024, %s397_s11, [#allocation18], %s3047_s23, %s3047_s23, %s3046_s30  }
  0xf8   : > { %s2574_s26 = scalar_lea.hbm %s2975_s0, %s2424_s12  ;;  %s414_s27 = scalar_lea.vmem [#allocation2], %s2421_s5 }
  0xf9   : > { %s422_s1 = sshll.u32 %s414_s27, 4  ;;  %s2583_s22 = scalar_lea.hbm %s2977_s2, %s2424_s12  ;;  %s2577_s1 = int_to_ptr.vmem [resolvable:$true] %s422_s1 }
  0xfa   : > { %s3048_s17 = sand.u32 1, %s2185_s19   ;;  %s2013_s30 = scalar_lea.hbm %s2574_s26, 32 }
  0xfb   : > { %s411_s11 = scalar_lea.sflag [#allocation3], %s3048_s17  ;;  %p2014_p3 = scmp.ne.s32.totalorder %s2574_s26, %s2013_s30 }
  0xfc   : > { %p3049_p12 = scmp.ne.s32.totalorder %s3041_s14, 0  ;;  %s2018_s29 = scalar_lea.hbm %s2975_s0, 64 }
  0xfd   : > { %p2019_p0 = scmp.lt.u32.totalorder %s2574_s26, %s2975_s0  ;;  %p2020_p2 = scmp.lt.u32.totalorder %s2018_s29, %s2013_s30 }
  0xfe   : > { %p2016_p9 = pnand %p2014_p3, %p3049_p12  ;;  %p2022_p1 = scmp.lt.u32.totalorder %s2013_s30, %s2574_s26 }
  0xff   : > { %p2021_p7 = por %p2020_p2, %p2019_p0 }
 0x100   : > { %p2017_p4 = pneg %p2016_p9 }
 0x101   : > { %p2023_p10 = por %p2022_p1, %p2021_p7 }
 0x103   : > { %p2024_p11 = pnand %p2023_p10, %p2017_p4 }
 0x105   : > { %2027 = shalt.err (!%p2024_p11)
}
 0x106   : > { %s2028_s25 = scalar_lea.vmem %s2577_s1, 32  ;;  %s2201_s27 = smov [#allocation2]  }
 0x107   : > { %p2029_p6 = scmp.ne.s32.totalorder %s2577_s1, %s2028_s25  ;;  %s2033_s21 = sshll.u32 %s2201_s27, 4  ;;  %s2034_s21 = int_to_ptr.vmem [resolvable:$false] %s2033_s21 }
 0x108   : > { %s2035_s13 = scalar_lea.vmem %s2034_s21, 64  ;;  %p2036_p5 = scmp.lt.s32.totalorder %s2577_s1, %s2034_s21 }
 0x109   : > { %p2031_p8 = pnand %p2029_p6, %p3049_p12  ;;  %p2037_p3 = scmp.lt.s32.totalorder %s2035_s13, %s2028_s25 }
 0x10b   : > { %p2032_p13 = pneg %p2031_p8  ;;  %p2038_p9 = por %p2037_p3, %p2036_p5 }
 0x10d   : > { %p2039_p0 = pnand %p2038_p9, %p2032_p13 }
 0x10f   : > { %2042 = shalt.err (!%p2039_p0)
}
 0x110   : > { %p3050_p4 = scmp.ne.s32.totalorder %s3039_s15, 0  ;;  %s452_s17 = scalar_lea.vmem [#allocation7], %s2421_s5 }
 0x111   : > { %s460_s30 = sshll.u32 %s452_s17, 4  ;;  %s2613_s29 = scalar_lea.hbm %s2979_s4, %s2424_s12  ;;  %s461_s30 = int_to_ptr.vmem [resolvable:$true] %s460_s30 }
 0x112   : > { %1661 = dma.hbm_to_vmem [thread:$0]  (!%p3050_p4), %s2574_s26, 32, %s2577_s1, %s411_s11  }
 0x113   : > { %s2043_s7 = scalar_lea.hbm %s2583_s22, 32  ;;  %s2048_s27 = scalar_lea.hbm %s2977_s2, 64 }
 0x114   : > { %p2044_p2 = scmp.ne.s32.totalorder %s2583_s22, %s2043_s7  ;;  %p2049_p10 = scmp.lt.u32.totalorder %s2583_s22, %s2977_s2 }
 0x115   : > { %p2050_p11 = scmp.lt.u32.totalorder %s2048_s27, %s2043_s7  ;;  %p2052_p8 = scmp.lt.u32.totalorder %s2043_s7, %s2583_s22 }
 0x116   : > { %p2046_p7 = pnand %p2044_p2, %p3049_p12 }
 0x117   : > { %p2051_p6 = por %p2050_p11, %p2049_p10 }
 0x118   : > { %p2047_p1 = pneg %p2046_p7 }
 0x119   : > { %p2053_p13 = por %p2052_p8, %p2051_p6 }
 0x11b   : > { %p2054_p5 = pnand %p2053_p13, %p2047_p1 }
 0x11d   : > { %2057 = shalt.err (!%p2054_p5)
}
 0x11e   : > { %s2058_s12 = scalar_lea.vmem %s461_s30, 32  ;;  %s2202_s26 = smov [#allocation7]  }
 0x11f   : > { %p2059_p3 = scmp.ne.s32.totalorder %s461_s30, %s2058_s12  ;;  %s2063_s1 = sshll.u32 %s2202_s26, 4  ;;  %s2064_s1 = int_to_ptr.vmem [resolvable:$false] %s2063_s1 }
 0x120   : > { %s2065_s11 = scalar_lea.vmem %s2064_s1, 64  ;;  %p2066_p2 = scmp.lt.s32.totalorder %s461_s30, %s2064_s1 }
 0x121   : > { %p2061_p9 = pnand %p2059_p3, %p3049_p12  ;;  %p2067_p7 = scmp.lt.s32.totalorder %s2065_s11, %s2058_s12 }
 0x123   : > { %p2062_p0 = pneg %p2061_p9  ;;  %p2068_p4 = por %p2067_p7, %p2066_p2 }
 0x125   : > { %p2069_p10 = pnand %p2068_p4, %p2062_p0 }
 0x127   : > { %2072 = shalt.err (!%p2069_p10)
}
 0x128   : > { %p3051_p11 = scmp.ne.s32.totalorder %s3039_s15, 0  ;;  %s490_s17 = scalar_lea.vmem [#allocation10], %s2421_s5 }
 0x129   : > { %s498_s23 = sshll.u32 %s490_s17, 4  ;;  %s2073_s3 = scalar_lea.hbm %s2613_s29, 32  ;;  %s499_s23 = int_to_ptr.vmem [resolvable:$true] %s498_s23 }
 0x12a   : > { %1667 = dma.hbm_to_vmem [thread:$0]  (!%p3051_p11), %s2583_s22, 32, %s461_s30, %s2442_s9  }
 0x12b   : > { %p2074_p1 = scmp.ne.s32.totalorder %s2613_s29, %s2073_s3  ;;  %s2078_s25 = scalar_lea.hbm %s2979_s4, 64 }
 0x12c   : > { %p2079_p8 = scmp.lt.u32.totalorder %s2613_s29, %s2979_s4  ;;  %p2080_p13 = scmp.lt.u32.totalorder %s2078_s25, %s2073_s3 }
 0x12d   : > { %p2076_p6 = pnand %p2074_p1, %p3049_p12  ;;  %p2082_p3 = scmp.lt.u32.totalorder %s2073_s3, %s2613_s29 }
 0x12e   : > { %p2081_p5 = por %p2080_p13, %p2079_p8 }
 0x12f   : > { %p2077_p4 = pneg %p2076_p6 }
 0x130   : > { %p2083_p9 = por %p2082_p3, %p2081_p5 }
 0x132   : > { %p2084_p0 = pnand %p2083_p9, %p2077_p4 }
 0x134   : > { %2087 = shalt.err (!%p2084_p0)
}
 0x135   : > { %s2088_s9 = scalar_lea.vmem %s499_s23, 32  ;;  %s2203_s5 = smov [#allocation10]  }
 0x136   : > { %p2089_p2 = scmp.ne.s32.totalorder %s499_s23, %s2088_s9  ;;  %s2093_s22 = sshll.u32 %s2203_s5, 4  ;;  %s2094_s22 = int_to_ptr.vmem [resolvable:$false] %s2093_s22 }
 0x137   : > { %s2095_s30 = scalar_lea.vmem %s2094_s22, 64  ;;  %p2096_p1 = scmp.lt.s32.totalorder %s499_s23, %s2094_s22 }
 0x138   : > { %p2091_p7 = pnand %p2089_p2, %p3049_p12  ;;  %p2097_p6 = scmp.lt.s32.totalorder %s2095_s30, %s2088_s9 }
 0x13a   : > { %p2092_p10 = pneg %p2091_p7  ;;  %p2098_p11 = por %p2097_p6, %p2096_p1 }
 0x13c   : > { %p2099_p8 = pnand %p2098_p11, %p2092_p10 }
 0x13e   : > { %2102 = shalt.err (!%p2099_p8)
}
 0x13f   : > { %p3052_p13 = scmp.ne.s32.totalorder %s3039_s15, 0  ;;  %p3053_p4 = scmp.ne.s32.totalorder %s3024_s24, 0 }
 0x140   : > { %s3054_s14 = sld [smem:[#allocation32_spill]] (!%p3053_p4)  ;;  %s2655_s13 = sand.u32 (!%p3053_p4), 1, %s2181_s18  }
 0x141   : > { %1673 = dma.hbm_to_vmem [thread:$0]  (!%p3052_p13), %s2613_s29, 32, %s499_s23, %s2485_s28  }
 0x142   : > { %507 = sbr.rel (%p3053_p4) target bundleno = 1300 (0x514), region = 64  ;;  %s2658_s12 = sshll.u32 (!%p3053_p4), %s2655_s13, 1 }
 0x143   : > { %s510_s26 = scalar_lea.sflag (!%p3053_p4), [#allocation3], %s2655_s13  ;;  %s513_s1 = scalar_lea.vmem (!%p3053_p4), [#allocation2], %s2658_s12 }
 0x146   : > { %p3055_p12 = scmp.ne.s32.totalorder (!%p3053_p4), %s3054_s14, 0 }
 0x149   : > { %2148 = dma.done.wait (%p3055_p12), %s510_s26, 32  }
 0x14a   : > { %2150 = vsyncadd (%p3055_p12), %s510_s26, 4294967264  ;;  %s3056_s28 = sld [smem:[#allocation29_spill]]  ;;  %s522_s29 = scalar_lea.vmem [#allocation5], %s2658_s12 }
 0x150   : > { %s518_s24 = sand.u32 1, %s3056_s28  }
 0x151   : > { %s519_s15 = scalar_lea.sflag [#allocation6], %s518_s24 }
 0x152   : > { %2152 = dma.done.wait (%p3055_p12), %s519_s15, 64  }
 0x153   : > { %2154 = vsyncadd (%p3055_p12), %s519_s15, 4294967232  ;;  %s531_s11 = scalar_lea.vmem [#allocation7], %s2658_s12  ;;  %s537_s17 = scalar_lea.sflag [#allocation9], %s518_s24 }
 0x154   : > { %s540_s23 = scalar_lea.vmem [#allocation8], %s2658_s12 }
 0x155   : > { %2156 = dma.done.wait (%p3055_p12), %s537_s17, 64  }
 0x156   : > { %2158 = vsyncadd (%p3055_p12), %s537_s17, 4294967232  ;;  %s549_s3 = scalar_lea.vmem [#allocation10], %s2658_s12  ;;  %p3057_p11 = scmp.eq.s32.totalorder %s3056_s28, 0 }
 0x158   : > { %2160 = dma.done.wait (%p3057_p11), [#allocation12], 128   ;;  %p3058_p5 = pmov %p3057_p11 }
 0x15a   : > { %2162 = vsyncadd (%p3058_p5), [#allocation12], 4294967168  ;;  %p3059_p3 = pmov %p3058_p5 }
 0x15c   : > { %2164 = dma.done.wait (%p3059_p3), [#allocation15], 1024   ;;  %p3060_p9 = pmov %p3059_p3 }
 0x15d   : > { %p3061_p0 = pmov %p3059_p3 }
 0x15e   : > { %2166 = vsyncadd (%p3060_p9), [#allocation15], 4294966272 }
 0x15f   : > { %2168 = dma.done.wait (%p3061_p0), [#allocation18], 2048   ;;  %p3062_p2 = pmov %p3061_p0 }
 0x160   : > { %v2204_v0 = vmov 0   ;;  %v639_v1 = vld [vmem:[#allocation11] sm:$0x7]  ;;  %v658_v2 = vld [vmem:[#allocation13] sm:$0x7]  ;;  %v688_v3 = vld [vmem:[#allocation16 + $0x10] sm:$0xff]  ;;  %v646_v15 = vlaneseq }
 0x161   : > { %2170 = vsyncadd (%p3062_p2), [#allocation18], 4294965248  ;;  %1735 = vset.pattern.permute.xlu0 %v2204_v0  ;;  %759 = vmatprep.mubr.bf16.mxu0 %v2204_v0  ;;  %v804_v4 = vld [vmem:[#allocation19] sm:$0xff]  ;;  %v806_v5 = vld [vmem:[#allocation19 + $0x10] sm:$0xff]  ;;  %vm717_vm0 = vcmask 1040384   ;;  %vm718_vm1 = vcmask 1041408  }
 0x162   : > { %1736 = vset.pattern.permute.xlu1 %v2204_v0  ;;  %907 = vmatprep.mubr.bf16.mxu1 %v2204_v0  ;;  %v808_v6 = vld [vmem:[#allocation19 + $0x20] sm:$0xff]  ;;  %v810_v7 = vld [vmem:[#allocation19 + $0x30] sm:$0xff]  ;;  %v687_v9 = vld [vmem:[#allocation16 + $0x8] sm:$0xff]  ;;  %v2695_v16 = vshrl.u32 %v646_v15, 7  ;;  %v2205_v34 = vmov 65535   ;;  %vm710_vm2 = vcmask 23552  }
 0x163   : > { %642 = vperm.xlu0 %1735, %v639_v1   ;;  %v686_v8 = vld [vmem:[#allocation16] sm:$0xff]  ;;  %v689_v10 = vld [vmem:[#allocation16 + $0x18] sm:$0xff]  ;;  %v805_v11 = vld [vmem:[#allocation19 + $0x8] sm:$0xff]  ;;  %v719_v35 = vsel %vm717_vm0, 4294967295, %v2205_v34  ;;  %vm852_vm3 = vcmask 261120   ;;  %s1573_s16 = sshll.u32 %s2655_s13, 3 }
 0x164   : > { %692 = vperm.xlu1 %1736, %v686_v8   ;;  %v807_v12 = vld [vmem:[#allocation19 + $0x18] sm:$0xff]  ;;  %v809_v13 = vld [vmem:[#allocation19 + $0x28] sm:$0xff]  ;;  %v2698_v17 = vsub.s32 0, %v2695_v16  ;;  %v2701_v18 = vsub.s32 1, %v2695_v16  ;;  %v638_v19 = vld [vmem:[%s513_s1] sm:$0x3] }
 0x165   : > { %v811_v14 = vld [vmem:[#allocation19 + $0x38] sm:$0xff]  ;;  %v720_v37 = vsel %vm718_vm1, %v719_v35, 0  ;;  %v678_v42 = vld [vmem:[#allocation14] sm:$0xff]  ;;  %v679_v43 = vld [vmem:[#allocation14 + $0x8] sm:$0xff]  ;;  %s3063_s21 = sld [smem:[#allocation33_spill]]  ;;  %s1583_s9 = sshll.u32 %s3056_s28, 7 }
 0x166   : > { %v649_v20 = vrot.slane %v638_v19, %v2698_v17  ;;  %v653_v21 = vrot.slane %v638_v19, %v2701_v18  ;;  %v682_v45 = vpack.c.bf16 %v679_v43, %v678_v42  ;;  %v680_v46 = vld [vmem:[#allocation14 + $0x10] sm:$0xff]  ;;  %v681_v47 = vld [vmem:[#allocation14 + $0x18] sm:$0xff]  ;;  %v788_v19 = vld [vmem:[#allocation17] sm:$0xff]  ;;  %v2726_v42 = vadd.s32 16, %v2695_v16  ;;  %s631_s5 = scalar_lea.vmem [#allocation20], %s1573_s16  ;;  %s3064_s26 = sld [smem:[#allocation40_spill]] }
 0x167   : > { %661 = vperm.xlu0 %1735, %v658_v2   ;;  %v683_v48 = vpack.c.bf16 %v681_v47, %v680_v46  ;;  %v2733_v47 = vadd.s32 24, %v2695_v16  ;;  %s1324_s22 = sshll.u32 %s631_s5, 4  ;;  %s1311_s28 = scalar_lea.sflag [#allocation4], %s2655_s13  ;;  %s2933_s22 = int_to_ptr.vmem [resolvable:$true] %s1324_s22 }
 0x168   : > { %697 = vperm.xlu1 %1736, %v687_v9   ;;  %s2103_s24 = scalar_lea.vmem %s2933_s22, 128  ;;  %s2207_s15 = smov [#allocation20]  }
 0x169   : > { %p2104_p7 = scmp.ne.s32.totalorder %s2933_s22, %s2103_s24 }
 0x16b   : > { %702 = vperm.xlu0 %1735, %v688_v3   ;;  %p3065_p10 = scmp.ne.s32.totalorder %s3063_s21, 0 }
 0x16c   : > { %707 = vperm.xlu1 %1736, %v689_v10   ;;  %s2931_s1 = scalar_lea.hbm %s3064_s26, %s1583_s9 }
 0x16d   : > { %p2105_p1 = pnand %p2104_p7, %p3065_p10 }
 0x16f   : > { %814 = vperm.xlu0 %1735, %v804_v4   ;;  %p2106_p6 = pneg %p2105_p1 }
 0x170   : > { %819 = vperm.xlu1 %1736, %v805_v11  }
 0x173   : > { %824 = vperm.xlu0 %1735, %v806_v5  }
 0x174   : > { %829 = vperm.xlu1 %1736, %v807_v12  }
 0x177   : > { %834 = vperm.xlu0 %1735, %v808_v6  }
 0x178   : > { %839 = vperm.xlu1 %1736, %v809_v13  }
 0x17b   : > { %844 = vperm.xlu0 %1735, %v810_v7  }
 0x17c   : > { %849 = vperm.xlu1 %1736, %v811_v14  }
 0x1e2   : > { %v643_v22 = vpop.permute.xlu0 %642 }
 0x1e3   : > { %v656_v23 = vmul.f32 %v649_v20, %v643_v22  ;;  %v657_v24 = vmul.f32 %v653_v21, %v643_v22  ;;  %v693_v49 = vpop.permute.xlu1 %692  ;;  %v789_v21 = vld [vmem:[#allocation17 + $0x8] sm:$0xff]  ;;  %v790_v22 = vld [vmem:[#allocation17 + $0x10] sm:$0xff] }
 0x1e6   : > { %v662_v25 = vpop.permute.xlu0 %661 }
 0x1e7   : > { %v664_v26 = vadd.f32 %v662_v25, %v656_v23  ;;  %v665_v27 = vadd.f32 %v662_v25, %v657_v24  ;;  %v698_v53 = vpop.permute.xlu1 %697  ;;  %v791_v23 = vld [vmem:[#allocation17 + $0x18] sm:$0xff]  ;;  %v796_v25 = vpack.c.bf16 %v789_v21, %v788_v19 }
 0x1e9   : > { %v1574_v28 = vmul.f32 -1.442695, %v664_v26  ;;  %v1575_v29 = vmul.f32 -1.442695, %v665_v27  ;;  %v797_v26 = vpack.c.bf16 %v791_v23, %v790_v22  ;;  %v792_v27 = vld [vmem:[#allocation17 + $0x20] sm:$0xff] }
 0x1ea   : > { %v703_v1 = vpop.permute.xlu0 %702 }
 0x1eb   : > { %1737 = vpow2.f32 %v1574_v28  ;;  %v708_v6 = vpop.permute.xlu1 %707  ;;  %v793_v28 = vld [vmem:[#allocation17 + $0x28] sm:$0xff] }
 0x1ec   : > { %1739 = vpow2.f32 %v1575_v29  ;;  %v798_v29 = vpack.c.bf16 %v793_v28, %v792_v27 }
 0x1f5   : > { %v1738_v30 = vpop.eup %1737 }
 0x1f6   : > { %v1740_v31 = vpop.eup %1739  ;;  %v672_v32 = vadd.f32 1.0, %v1738_v30  ;;  %v794_v30 = vld [vmem:[#allocation17 + $0x30] sm:$0xff] }
 0x1f7   : > { %v673_v33 = vadd.f32 1.0, %v1740_v31  ;;  %v795_v31 = vld [vmem:[#allocation17 + $0x38] sm:$0xff] }
 0x1f8   : > { %1741 = vrcp.f32 %v672_v32  ;;  %v799_v32 = vpack.c.bf16 %v795_v31, %v794_v30 }
 0x1f9   : > { %1743 = vrcp.f32 %v673_v33  ;;  %v2714_v33 = vld [vmem:[%s540_s23] sm:$0x3] }
 0x1fa   : > { %v1101_v34 = vrot.slane %v2714_v33, %v2698_v17  ;;  %v1105_v35 = vrot.slane %v2714_v33, %v2701_v18 }
 0x202   : > { %v1742_v36 = vpop.eup %1741 }
 0x203   : > { %v1744_v38 = vpop.eup %1743  ;;  %v684_v39 = vpack.c.bf16 %v1742_v36, %v1742_v36  ;;  %v1108_v36 = vsel %vm717_vm0, %v1101_v34, 0.0 }
 0x204   : > { %v685_v40 = vpack.c.bf16 %v1744_v38, %v1744_v38 }
 0x205   : > { %v722_v41 = vand.u32 %v720_v37, %v684_v39  ;;  %v820_v39 = vpop.permute.xlu1 %819 }
 0x206   : > { %v725_v44 = vand.u32 %v720_v37, %v685_v40  ;;  %v1109_v37 = vsel %vm717_vm0, %v1105_v35, 0.0  ;;  %v943_v40 = vld [vmem:[%s522_s29] sm:$0x3]  ;;  %s2107_s29 = sshll.u32 %s2207_s15, 4  ;;  %s2108_s29 = int_to_ptr.vmem [resolvable:$false] %s2107_s29 }
 0x207   : > { %v1110_v38 = vadd.f32 %v1109_v37, %v1108_v36  ;;  %v1018_v43 = vrot.slane %v943_v40, %v2701_v18  ;;  %p2110_p8 = scmp.lt.s32.totalorder %s2933_s22, %s2108_s29 }
 0x208   : > { %727 = vmatprep.subr.bf16.mxu0 %v725_v44  ;;  %v2730_v44 = vadd.s32 8, %v2695_v16 }
 0x209   : > { %728 = vmatpush1.bf16.msra.mxu0 %v722_v41  ;;  %1111 = vadd.xlane.f32.xlu1 %v1110_v38  ;;  %v1014_v41 = vrot.slane %v943_v40, %v2698_v17  ;;  %v830_v46 = vpop.permute.xlu1 %829  ;;  %vm1020_vm6 = vcmp.eq.s32.totalorder %v2695_v16, %v1018_v43  ;;  %vm1024_vm8 = vcmp.eq.s32.totalorder %v2726_v42, %v1018_v43 }
 0x20a   : > { %vm1022_vm10 = vcmp.eq.s32.totalorder %v2730_v44, %v1018_v43  ;;  %vm1026_vm11 = vcmp.eq.s32.totalorder %v2733_v47, %v1018_v43 }
 0x20b   : > { %vm1019_vm4 = vcmp.eq.s32.totalorder %v2695_v16, %v1014_v41  ;;  %vm1023_vm5 = vcmp.eq.s32.totalorder %v2726_v42, %v1014_v41  ;;  %vm1021_vm7 = vcmp.eq.s32.totalorder %v2730_v44, %v1014_v41  ;;  %vm1025_vm9 = vcmp.eq.s32.totalorder %v2733_v47, %v1014_v41 }
 0x20c   : > { %1576 = vmatmul.mubr.msk.bf16.vlgmr.msra.gmra.mrb[0].mxu0 %vm710_vm2, %v682_v45 }
 0x20d   : > { %769 = vmatprep.mubr.bf16.mxu0 %v2204_v0  ;;  %v840_v27 = vpop.permute.xlu1 %839 }
 0x214   : > { %1577 = vmatmul.mubr.msk.bf16.gmra.mrb[4].mxu0 %vm710_vm2, %v683_v48 }
 0x215   : > { %897 = vmatprep.mubr.bf16.mxu0 %v2204_v0 }
 0x2df   : > { %v761_v50 = vpop.f32.mrb[0].mxu0 }
 0x2e0   : > { %v762_v51 = vadd.f32 %v761_v50, %v693_v49  ;;  %v763_v52 = vpop.f32.mrb[1].mxu0 }
 0x2e1   : > { %v764_v54 = vadd.f32 %v763_v52, %v693_v49  ;;  %v765_v55 = vpop.f32.mrb[2].mxu0 }
 0x2e2   : > { %v766_v56 = vadd.f32 %v765_v55, %v698_v53  ;;  %v767_v57 = vpop.f32.mrb[3].mxu0  ;;  %v780_v59 = vmax.f32 %v762_v51, 0.0 }
 0x2e3   : > { %v768_v58 = vadd.f32 %v767_v57, %v698_v53  ;;  %v781_v61 = vmax.f32 %v764_v54, 0.0  ;;  %v1120_v54 = vld [vmem:[%s531_s11] sm:$0x3]  ;;  %s2109_s11 = scalar_lea.vmem %s2108_s29, 256 }
 0x2e4   : > { %v782_v60 = vmax.f32 %v766_v56, 0.0  ;;  %p2111_p13 = scmp.lt.s32.totalorder %s2109_s11, %s2103_s24 }
 0x2e5   : > { %v783_v62 = vmax.f32 %v768_v58, 0.0 }
 0x2e6   : > { %v800_v63 = vpack.c.bf16 %v782_v60, %v780_v59  ;;  %p2112_p4 = por %p2111_p13, %p2110_p8 }
 0x2e7   : > { %v801_v2 = vpack.c.bf16 %v783_v62, %v781_v61  ;;  %v771_v3 = vpop.f32.mrb[4].mxu0 }
 0x2e8   : > { %v772_v4 = vadd.f32 %v771_v3, %v703_v1  ;;  %v773_v5 = vpop.f32.mrb[5].mxu0  ;;  %p2113_p12 = pnand %p2112_p4, %p2106_p6 }
 0x2e9   : > { %v774_v7 = vadd.f32 %v773_v5, %v703_v1  ;;  %v775_v8 = vpop.f32.mrb[6].mxu0  ;;  %865 = vmatprep.subr.bf16.mxu0 %v801_v2  ;;  %1591 = vmatprep.subr.bf16.mxu1 %v801_v2  ;;  %v2761_v2 = vrot.slane %v1120_v54, %v2698_v17 }
 0x2ea   : > { %v776_v9 = vadd.f32 %v775_v8, %v708_v6  ;;  %v777_v10 = vpop.f32.mrb[7].mxu0  ;;  %866 = vmatpush1.bf16.msra.mxu0 %v800_v63  ;;  %1593 = vmatpush1.bf16.msra.mxu1 %v800_v63  ;;  %v784_v12 = vmax.f32 %v772_v4, 0.0 }
 0x2eb   : > { %v778_v11 = vadd.f32 %v777_v10, %v708_v6  ;;  %v785_v14 = vmax.f32 %v774_v7, 0.0  ;;  %vm1196_vm12 = vcmp.eq.s32.totalorder %v2695_v16, %v2761_v2  ;;  %vm1198_vm13 = vcmp.eq.s32.totalorder %v2730_v44, %v2761_v2 }
 0x2ec   : > { %v786_v13 = vmax.f32 %v776_v9, 0.0  ;;  %v2775_v9 = vrot.slane %v1120_v54, %v2701_v18  ;;  %vm1200_vm1 = vcmp.eq.s32.totalorder %v2726_v42, %v2761_v2 }
 0x2ed   : > { %v787_v15 = vmax.f32 %v778_v11, 0.0 }
 0x2ee   : > { %v802_v20 = vpack.c.bf16 %v786_v13, %v784_v12  ;;  %vm1197_vm14 = vcmp.eq.s32.totalorder %v2695_v16, %v2775_v9  ;;  %vm1199_vm15 = vcmp.eq.s32.totalorder %v2730_v44, %v2775_v9  ;;  %vm1201_vm2 = vcmp.eq.s32.totalorder %v2726_v42, %v2775_v9 }
 0x2ef   : > { %v803_v24 = vpack.c.bf16 %v787_v15, %v785_v14 }
 0x2f1   : > { %867 = vmatprep.subr.bf16.mxu0 %v803_v24  ;;  %1592 = vmatprep.subr.bf16.mxu1 %v803_v24 }
 0x2f2   : > { %868 = vmatpush1.bf16.msra.mxu0 %v802_v20  ;;  %1594 = vmatpush1.bf16.msra.mxu1 %v802_v20 }
 0x2f5   : > { %1578 = vmatmul.mubr.msk.bf16.vlgmr.msra.gmra.mrb[8].mxu0 %vm852_vm3, %v796_v25  ;;  %1579 = vmatmul.mubr.msk.bf16.vlgmr.msra.gmra.mrb[0].mxu1 %vm852_vm3, %v797_v26 }
 0x2f6   : > { %917 = vmatprep.mubr.bf16.mxu1 %v2204_v0 }
 0x2fd   : > { %1580 = vmatmul.mubr.msk.bf16.gmra.mrb[4].mxu1 %vm852_vm3, %v798_v29 }
 0x2fe   : > { %927 = vmatprep.mubr.bf16.mxu1 %v2204_v0  ;;  %v815_v0 = vpop.permute.xlu0 %814 }
 0x302   : > { %v825_v45 = vpop.permute.xlu0 %824 }
 0x305   : > { %1581 = vmatmul.mubr.msk.bf16.gmra.mrb[8].mxu1 %vm852_vm3, %v799_v32  ;;  %vm1202_vm3 = vcmp.eq.s32.totalorder %v2733_v47, %v2761_v2 }
 0x306   : > { %v835_v14 = vpop.permute.xlu0 %834 }
 0x3c8   : > { %v899_v48 = vpop.f32.mrb[8].mxu0  ;;  %v909_v49 = vpop.f32.mrb[0].mxu1 }
 0x3c9   : > { %v2735_v50 = vadd.f32 %v899_v48, %v815_v0  ;;  %v2738_v51 = vadd.f32 %v909_v49, %v825_v45  ;;  %v901_v52 = vpop.f32.mrb[9].mxu0  ;;  %v911_v53 = vpop.f32.mrb[1].mxu1 }
 0x3ca   : > { %v2743_v55 = vadd.f32 %v901_v52, %v815_v0  ;;  %v2746_v56 = vadd.f32 %v911_v53, %v825_v45  ;;  %v903_v57 = vpop.f32.mrb[10].mxu0  ;;  %v913_v58 = vpop.f32.mrb[2].mxu1 }
 0x3cb   : > { %v945_v59 = vmax.f32 %v2735_v50, %v2738_v51  ;;  %v2752_v60 = vadd.f32 %v903_v57, %v820_v39  ;;  %v905_v61 = vpop.f32.mrb[11].mxu0  ;;  %v915_v62 = vpop.f32.mrb[3].mxu1  ;;  %v2757_v1 = vadd.f32 %v913_v58, %v830_v46  ;;  %v1027_v3 = vsel %vm1019_vm4, %v2735_v50, 0.0 }
 0x3cc   : > { %v954_v63 = vmax.f32 %v2743_v55, %v2746_v56  ;;  %v2767_v5 = vadd.f32 %v905_v61, %v820_v39  ;;  %v2769_v6 = vadd.f32 %v915_v62, %v830_v46  ;;  %v1031_v10 = vsel %vm1023_vm5, %v2738_v51, 0.0  ;;  %v845_v53 = vpop.permute.xlu0 %844  ;;  %v850_v62 = vpop.permute.xlu1 %849 }
 0x3cd   : > { %v1029_v4 = vsel %vm1021_vm7, %v2752_v60, 0.0  ;;  %v946_v8 = vmax.f32 %v2752_v60, %v2757_v1  ;;  %v1028_v11 = vsel %vm1020_vm6, %v2743_v55, 0.0  ;;  %v1032_v22 = vsel %vm1024_vm8, %v2746_v56, 0.0 }
 0x3ce   : > { %v1035_v7 = vadd.f32 %v1029_v4, %v1027_v3  ;;  %v1030_v12 = vsel %vm1022_vm10, %v2767_v5, 0.0  ;;  %v955_v13 = vmax.f32 %v2767_v5, %v2769_v6  ;;  %v1033_v23 = vsel %vm1025_vm9, %v2757_v1, 0.0 }
 0x3cf   : > { %v947_v15 = vmax.f32 %v945_v59, %v946_v8  ;;  %v1044_v20 = vadd.f32 %v1030_v12, %v1028_v11  ;;  %v1034_v34 = vsel %vm1026_vm11, %v2769_v6, 0.0  ;;  %vm1203_vm4 = vcmp.eq.s32.totalorder %v2733_v47, %v2775_v9 }
 0x3d0   : > { %v1036_v19 = vadd.f32 %v1035_v7, %v1031_v10  ;;  %v919_v21 = vpop.f32.mrb[4].mxu1  ;;  %v956_v24 = vmax.f32 %v954_v63, %v955_v13  ;;  %vm1300_vm5 = vcmp.eq.s32.totalorder %v2695_v16, 1  ;;  %vm1303_vm6 = vcmp.eq.s32.totalorder %v2695_v16, 2 }
 0x3d1   : > { %v2794_v25 = vadd.f32 %v919_v21, %v835_v14  ;;  %v921_v26 = vpop.f32.mrb[5].mxu1  ;;  %v948_v28 = vrot.slane %v947_v15, 4  ;;  %v1045_v30 = vadd.f32 %v1044_v20, %v1032_v22  ;;  %vm1306_vm7 = vcmp.eq.s32.totalorder %v2695_v16, 3 }
 0x3d2   : > { %v2796_v29 = vadd.f32 %v1036_v19, %v1033_v23  ;;  %v923_v31 = vpop.f32.mrb[6].mxu1  ;;  %v957_v32 = vrot.slane %v956_v24, 4  ;;  %v2803_v35 = vadd.f32 %v921_v26, %v835_v14 }
 0x3d3   : > { %v2805_v36 = vadd.f32 %v923_v31, %v840_v27  ;;  %v925_v37 = vpop.f32.mrb[7].mxu1  ;;  %v949_v38 = vmax.f32 %v947_v15, %v948_v28  ;;  %v2807_v0 = vadd.f32 %v1045_v30, %v1034_v34  ;;  %v1204_v40 = vsel %vm1196_vm12, %v2794_v25, 0.0 }
 0x3d4   : > { %v958_v39 = vmax.f32 %v956_v24, %v957_v32  ;;  %v2818_v43 = vadd.f32 %v925_v37, %v840_v27  ;;  %v1205_v49 = vsel %vm1197_vm14, %v2803_v35, 0.0 }
 0x3d5   : > { %v1206_v41 = vsel %vm1198_vm13, %v2805_v36, 0.0  ;;  %v950_v45 = vrot.slane %v949_v38, 2 }
 0x3d6   : > { %v1212_v46 = vadd.f32 %v1206_v41, %v1204_v40  ;;  %v959_v48 = vrot.slane %v958_v39, 2  ;;  %v1207_v52 = vsel %vm1199_vm15, %v2818_v43, 0.0 }
 0x3d7   : > { %v951_v54 = vmax.f32 %v949_v38, %v950_v45  ;;  %v1221_v44 = vadd.f32 %v1207_v52, %v1205_v49 }
 0x3d8   : > { %v929_v57 = vpop.f32.mrb[8].mxu1  ;;  %v960_v58 = vmax.f32 %v958_v39, %v959_v48 }
 0x3d9   : > { %v2824_v59 = vadd.f32 %v929_v57, %v845_v53  ;;  %v931_v61 = vpop.f32.mrb[9].mxu1  ;;  %v952_v63 = vrot.slane %v951_v54, 1 }
 0x3da   : > { %v2826_v3 = vadd.f32 %v931_v61, %v845_v53  ;;  %v933_v4 = vpop.f32.mrb[10].mxu1  ;;  %v961_v7 = vrot.slane %v960_v58, 1 }
 0x3db   : > { %v1122_v8 = vmax.f32 %v2794_v25, %v2824_v59  ;;  %v1208_v10 = vsel %vm1200_vm1, %v2824_v59, 0.0  ;;  %v2833_v11 = vadd.f32 %v933_v4, %v850_v62  ;;  %v935_v12 = vpop.f32.mrb[11].mxu1  ;;  %v2835_v13 = vmax.f32 %v951_v54, %v952_v63 }
 0x3dc   : > { %v1213_v14 = vadd.f32 %v1212_v46, %v1208_v10  ;;  %v2837_v15 = vmax.f32 %v960_v58, %v961_v7  ;;  %v1131_v19 = vmax.f32 %v2803_v35, %v2826_v3  ;;  %v1209_v42 = vsel %vm1201_vm2, %v2826_v3, 0.0 }
 0x3dd   : > { %v1123_v20 = vmax.f32 %v2805_v36, %v2833_v11  ;;  %v963_v21 = vsub.f32 %v2735_v50, %v2835_v13  ;;  %v965_v22 = vsub.f32 %v2752_v60, %v2835_v13  ;;  %v967_v23 = vsub.f32 %v2738_v51, %v2835_v13 }
 0x3de   : > { %v969_v24 = vsub.f32 %v2757_v1, %v2835_v13  ;;  %v964_v26 = vsub.f32 %v2743_v55, %v2837_v15  ;;  %v966_v27 = vsub.f32 %v2767_v5, %v2837_v15  ;;  %v968_v28 = vsub.f32 %v2746_v56, %v2837_v15 }
 0x3df   : > { %v971_v50 = vmul.f32 1.442695, %v963_v21  ;;  %v975_v60 = vmul.f32 1.442695, %v965_v22  ;;  %v979_v30 = vmul.f32 1.442695, %v967_v23  ;;  %v970_v51 = vsub.f32 %v2769_v6, %v2837_v15 }
 0x3e0   : > { %v983_v31 = vmul.f32 1.442695, %v969_v24  ;;  %v1222_v1 = vadd.f32 %v1221_v44, %v1209_v42  ;;  %v973_v32 = vmul.f32 1.442695, %v964_v26  ;;  %v977_v55 = vmul.f32 1.442695, %v966_v27 }
 0x3e1   : > { %1745 = vpow2.f32 %v971_v50  ;;  %v1124_v5 = vmax.f32 %v1122_v8, %v1123_v20  ;;  %v1210_v56 = vsel %vm1202_vm3, %v2833_v11, 0.0  ;;  %v2865_v34 = vadd.f32 %v935_v12, %v850_v62 }
 0x3e2   : > { %1747 = vpow2.f32 %v975_v60  ;;  %v981_v2 = vmul.f32 1.442695, %v968_v28  ;;  %v2867_v37 = vadd.f32 %v1213_v14, %v1210_v56  ;;  %v985_v47 = vmul.f32 1.442695, %v970_v51 }
 0x3e3   : > { %1749 = vpow2.f32 %v979_v30  ;;  %v1125_v6 = vrot.slane %v1124_v5, 4  ;;  %v1132_v38 = vmax.f32 %v2818_v43, %v2865_v34  ;;  %v1211_v39 = vsel %vm1203_vm4, %v2865_v34, 0.0 }
 0x3e4   : > { %1751 = vpow2.f32 %v983_v31  ;;  %v2872_v40 = vadd.f32 %v1222_v1, %v1211_v39 }
 0x3e5   : > { %1753 = vpow2.f32 %v973_v32  ;;  %v1126_v9 = vmax.f32 %v1124_v5, %v1125_v6  ;;  %v1133_v41 = vmax.f32 %v1131_v19, %v1132_v38  ;;  %v1038_v5 = vrot.slane %v2796_v29, 4 }
 0x3e6   : > { %1755 = vpow2.f32 %v977_v55 }
 0x3e7   : > { %1757 = vpow2.f32 %v981_v2  ;;  %v1127_v45 = vrot.slane %v1126_v9, 2  ;;  %v1134_v46 = vrot.slane %v1133_v41, 4 }
 0x3e8   : > { %1759 = vpow2.f32 %v985_v47 }
 0x3e9   : > { %v1128_v48 = vmax.f32 %v1126_v9, %v1127_v45  ;;  %v1135_v49 = vmax.f32 %v1133_v41, %v1134_v46 }
 0x3eb   : > { %v1746_v52 = vpop.eup %1745  ;;  %v1129_v54 = vrot.slane %v1128_v48, 1  ;;  %v1136_v44 = vrot.slane %v1135_v49, 2 }
 0x3ec   : > { %v1748_v53 = vpop.eup %1747 }
 0x3ed   : > { %v1750_v57 = vpop.eup %1749  ;;  %v987_v58 = vadd.f32 %v1748_v53, %v1746_v52  ;;  %v2874_v62 = vmax.f32 %v1128_v48, %v1129_v54  ;;  %v1137_v63 = vmax.f32 %v1135_v49, %v1136_v44 }
 0x3ee   : > { %v1752_v61 = vpop.eup %1751 }
 0x3ef   : > { %v1754_v4 = vpop.eup %1753  ;;  %v988_v7 = vadd.f32 %v1750_v57, %v987_v58  ;;  %v1140_v10 = vsub.f32 %v2794_v25, %v2874_v62  ;;  %v1142_v12 = vsub.f32 %v2805_v36, %v2874_v62  ;;  %v1144_v14 = vsub.f32 %v2824_v59, %v2874_v62 }
 0x3f0   : > { %v1756_v8 = vpop.eup %1755  ;;  %v1146_v19 = vsub.f32 %v2833_v11, %v2874_v62  ;;  %v1138_v21 = vrot.slane %v1137_v63, 1 }
 0x3f1   : > { %v989_v42 = vadd.f32 %v1752_v61, %v988_v7  ;;  %v996_v20 = vadd.f32 %v1756_v8, %v1754_v4  ;;  %v1758_v22 = vpop.eup %1757  ;;  %v1148_v23 = vmul.f32 1.442695, %v1140_v10  ;;  %v1152_v24 = vmul.f32 1.442695, %v1142_v12 }
 0x3f2   : > { %v1156_v28 = vmul.f32 1.442695, %v1144_v14  ;;  %v2884_v50 = vmax.f32 %v1137_v63, %v1138_v21  ;;  %v1760_v25 = vpop.eup %1759  ;;  %v1160_v36 = vmul.f32 1.442695, %v1146_v19 }
 0x3f3   : > { %v990_v26 = vrot.slane %v989_v42, 4  ;;  %v997_v27 = vadd.f32 %v1758_v22, %v996_v20  ;;  %1761 = vpow2.f32 %v1148_v23 }
 0x3f4   : > { %1763 = vpow2.f32 %v1152_v24  ;;  %v1141_v59 = vsub.f32 %v2803_v35, %v2884_v50  ;;  %v1143_v11 = vsub.f32 %v2818_v43, %v2884_v50  ;;  %v1145_v51 = vsub.f32 %v2826_v3, %v2884_v50 }
 0x3f5   : > { %v991_v60 = vadd.f32 %v990_v26, %v989_v42  ;;  %v998_v30 = vadd.f32 %v1760_v25, %v997_v27  ;;  %v1147_v31 = vsub.f32 %v2865_v34, %v2884_v50  ;;  %1765 = vpow2.f32 %v1156_v28 }
 0x3f6   : > { %v1150_v55 = vmul.f32 1.442695, %v1141_v59  ;;  %1767 = vpow2.f32 %v1160_v36  ;;  %v1154_v56 = vmul.f32 1.442695, %v1143_v11  ;;  %v1158_v2 = vmul.f32 1.442695, %v1145_v51 }
 0x3f7   : > { %v992_v1 = vrot.slane %v991_v60, 2  ;;  %v999_v32 = vrot.slane %v998_v30, 4  ;;  %v1162_v43 = vmul.f32 1.442695, %v1147_v31  ;;  %v1039_v3 = vadd.f32 %v1038_v5, %v2796_v29 }
 0x3f8   : > { %1769 = vpow2.f32 %v1150_v55  ;;  %v1047_v34 = vrot.slane %v2807_v0, 4  ;;  %v2206_v24 = vmov 1966171168   ;;  %v1215_v27 = vrot.slane %v2867_v37, 4 }
 0x3f9   : > { %v993_v6 = vadd.f32 %v992_v1, %v991_v60  ;;  %v1000_v35 = vadd.f32 %v999_v32, %v998_v30  ;;  %1771 = vpow2.f32 %v1154_v56  ;;  %v1040_v48 = vrot.slane %v1039_v3, 2 }
 0x3fa   : > { %1773 = vpow2.f32 %v1158_v2  ;;  %v1048_v49 = vadd.f32 %v1047_v34, %v2807_v0  ;;  %v1059_v26 = vunpack.c.l.s4 %v2206_v24  ;;  %v1216_v55 = vadd.f32 %v1215_v27, %v2867_v37 }
 0x3fb   : > { %v994_v38 = vrot.slane %v993_v6, 1  ;;  %v1001_v39 = vrot.slane %v1000_v35, 2  ;;  %1775 = vpow2.f32 %v1162_v43  ;;  %v1041_v61 = vadd.f32 %v1040_v48, %v1039_v3 }
 0x3fc   : > { %v1049_v63 = vrot.slane %v1048_v49, 2  ;;  %v1060_v32 = vunpack.c.0.s8 %v1059_v26 }
 0x3fd   : > { %v995_v47 = vadd.f32 %v994_v38, %v993_v6  ;;  %v1002_v9 = vadd.f32 %v1001_v39, %v1000_v35  ;;  %v1762_v41 = vpop.eup %1761  ;;  %v1042_v19 = vrot.slane %v1041_v61, 1  ;;  %v1224_v35 = vrot.slane %v2872_v40, 4 }
 0x3fe   : > { %v1764_v45 = vpop.eup %1763  ;;  %v1050_v42 = vadd.f32 %v1049_v63, %v1048_v49  ;;  %v1063_v38 = vsub.s32 %v1060_v32, %v2695_v16  ;;  %v1217_v39 = vrot.slane %v1216_v55, 2 }
 0x3ff   : > { %1777 = vlog2.f32 %v995_v47  ;;  %v1003_v46 = vrot.slane %v1002_v9, 1  ;;  %v1164_v52 = vadd.f32 %v1764_v45, %v1762_v41  ;;  %v1766_v53 = vpop.eup %1765  ;;  %v1043_v36 = vadd.f32 %v1042_v19, %v1041_v61 }
 0x400   : > { %v1768_v44 = vpop.eup %1767  ;;  %v1051_v60 = vrot.slane %v1050_v42, 1  ;;  %v1225_v34 = vadd.f32 %v1224_v35, %v2872_v40  ;;  %v1218_v37 = vadd.f32 %v1217_v39, %v1216_v55 }
 0x401   : > { %v1004_v54 = vadd.f32 %v1003_v46, %v1002_v9  ;;  %v1165_v57 = vadd.f32 %v1766_v53, %v1164_v52 }
 0x402   : > { %v1770_v58 = vpop.eup %1769  ;;  %v1052_v2 = vadd.f32 %v1051_v60, %v1050_v42  ;;  %v1226_v45 = vrot.slane %v1225_v34, 2  ;;  %v1219_v48 = vrot.slane %v1218_v37, 1  ;;  %v1121_v42 = vld [vmem:[%s549_s3] sm:$0x3] }
 0x403   : > { %1779 = vlog2.f32 %v1004_v54  ;;  %v1772_v29 = vpop.eup %1771  ;;  %v1166_v4 = vadd.f32 %v1768_v44, %v1165_v57 }
 0x404   : > { %v1173_v7 = vadd.f32 %v1772_v29, %v1770_v58  ;;  %v1774_v8 = vpop.eup %1773  ;;  %v1227_v52 = vadd.f32 %v1226_v45, %v1225_v34  ;;  %v1220_v29 = vadd.f32 %v1219_v48, %v1218_v37 }
 0x405   : > { %v1167_v10 = vrot.slane %v1166_v4, 4  ;;  %v1776_v14 = vpop.eup %1775 }
 0x406   : > { %v1174_v12 = vadd.f32 %v1774_v8, %v1173_v7  ;;  %v1228_v63 = vrot.slane %v1227_v52, 1 }
 0x407   : > { %v1168_v20 = vadd.f32 %v1167_v10, %v1166_v4 }
 0x408   : > { %v1175_v21 = vadd.f32 %v1776_v14, %v1174_v12  ;;  %v1229_v10 = vadd.f32 %v1228_v63, %v1227_v52 }
 0x409   : > { %v1778_v0 = vpop.eup %1777  ;;  %v1169_v23 = vrot.slane %v1168_v20, 2 }
 0x40a   : > { %v1006_v22 = vmul.f32 0.6931472, %v1778_v0  ;;  %v1176_v28 = vrot.slane %v1175_v21, 4 }
 0x40b   : > { %v1170_v30 = vadd.f32 %v1169_v23, %v1168_v20 }
 0x40c   : > { %v1009_v25 = vadd.f32 %v1006_v22, %v2835_v13  ;;  %v1177_v11 = vadd.f32 %v1176_v28, %v1175_v21  ;;  %v1278_v21 = vrot.slane %v1121_v42, %v2698_v17 }
 0x40d   : > { %v1780_v59 = vpop.eup %1779  ;;  %v1171_v1 = vrot.slane %v1170_v30, 1 }
 0x40e   : > { %v1053_v51 = vsub.f32 %v1009_v25, %v1043_v36  ;;  %v1008_v31 = vmul.f32 0.6931472, %v1780_v59  ;;  %v1178_v5 = vrot.slane %v1177_v11, 2  ;;  %v1285_v26 = vsel %vm717_vm0, %v1278_v21, 0.0  ;;  %v1112_v36 = vpop.xlane.xlu1 %1111 }
 0x40f   : > { %v1172_v6 = vadd.f32 %v1171_v1, %v1170_v30  ;;  %v1113_v60 = vrot.slane %v1112_v36, 4 }
 0x410   : > { %v1010_v56 = vadd.f32 %v1008_v31, %v2837_v15  ;;  %v1179_v43 = vadd.f32 %v1178_v5, %v1177_v11 }
 0x411   : > { %1781 = vlog2.f32 %v1172_v6  ;;  %v1114_v30 = vadd.f32 %v1113_v60, %v1112_v36 }
 0x412   : > { %v1054_v13 = vsub.f32 %v1010_v56, %v1052_v2  ;;  %v1180_v3 = vrot.slane %v1179_v43, 1 }
 0x413   : > { %v1115_v59 = vrot.slane %v1114_v30, 2 }
 0x414   : > { %v1057_v47 = vcombine.low %v1053_v51, %v1054_v13  ;;  %v1181_v9 = vadd.f32 %v1180_v3, %v1179_v43 }
 0x415   : > { %v1116_v51 = vadd.f32 %v1115_v59, %v1114_v30 }
 0x416   : > { %v1064_v41 = vrot.slane %v1057_v47, %v1063_v38  ;;  %1783 = vlog2.f32 %v1181_v9 }
 0x417   : > { %v1117_v1 = vrot.slane %v1116_v51, 1 }
 0x418   : > { %v1071_v15 = vrot.slane %v1064_v41, %v1063_v38 }
 0x419   : > { %v1118_v5 = vadd.f32 %v1117_v1, %v1116_v51 }
 0x41a   : > { %v1073_v46 = vmul.f32 %v1071_v15, %v2714_v33 }
 0x41b   : > { %v1782_v49 = vpop.eup %1781 }
 0x41c   : > { %v1078_v53 = vrot.slane %v1073_v46, %v2698_v17  ;;  %v1082_v54 = vrot.slane %v1073_v46, %v2701_v18  ;;  %v1183_v44 = vmul.f32 0.6931472, %v1782_v49 }
 0x41e   : > { %v1085_v40 = vsel %vm717_vm0, %v1078_v53, 0.0  ;;  %v1086_v57 = vsel %vm717_vm0, %v1082_v54, 0.0  ;;  %v1186_v58 = vadd.f32 %v1183_v44, %v2874_v62  ;;  %v1282_v62 = vrot.slane %v1121_v42, %v2701_v18 }
 0x41f   : > { %v1087_v61 = vadd.f32 %v1086_v57, %v1085_v40 }
 0x420   : > { %v1784_v4 = vpop.eup %1783  ;;  %v1230_v33 = vsub.f32 %v1186_v58, %v1220_v29  ;;  %v1286_v27 = vsel %vm717_vm0, %v1282_v62, 0.0 }
 0x421   : > { %1088 = vadd.xlane.f32.xlu0 %v1087_v61  ;;  %v1185_v7 = vmul.f32 0.6931472, %v1784_v4  ;;  %v1287_v25 = vadd.f32 %v1286_v27, %v1285_v26 }
 0x423   : > { %v1187_v8 = vadd.f32 %v1185_v7, %v2884_v50 }
 0x425   : > { %v1231_v12 = vsub.f32 %v1187_v8, %v1229_v10 }
 0x427   : > { %v1234_v14 = vcombine.low %v1230_v33, %v1231_v12 }
 0x429   : > { %v1241_v19 = vrot.slane %v1234_v14, %v1063_v38 }
 0x42b   : > { %v1248_v20 = vrot.slane %v1241_v19, %v1063_v38 }
 0x42d   : > { %v1250_v0 = vmul.f32 %v1248_v20, %v1121_v42 }
 0x42f   : > { %v1255_v22 = vrot.slane %v1250_v0, %v2698_v17  ;;  %v1259_v23 = vrot.slane %v1250_v0, %v2701_v18 }
 0x431   : > { %v1262_v24 = vsel %vm717_vm0, %v1255_v22, 0.0  ;;  %v1263_v50 = vsel %vm717_vm0, %v1259_v23, 0.0  ;;  %vm1297_vm0 = vcmp.eq.s32.totalorder %v2695_v16, 0 }
 0x432   : > { %v1264_v28 = vadd.f32 %v1263_v50, %v1262_v24 }
 0x434   : > { %1265 = vadd.xlane.f32.xlu0 %v1264_v28 }
 0x438   : > { %1288 = vadd.xlane.f32.xlu0 %v1287_v25 }
 0x4ae   : > { %v1089_v11 = vpop.xlane.xlu0 %1088 }
 0x4af   : > { %v1090_v17 = vrot.slane %v1089_v11, 4 }
 0x4b1   : > { %v1091_v18 = vadd.f32 %v1090_v17, %v1089_v11 }
 0x4b3   : > { %v1092_v31 = vrot.slane %v1091_v18, 2 }
 0x4b5   : > { %v1093_v32 = vadd.f32 %v1092_v31, %v1091_v18 }
 0x4b7   : > { %v1094_v55 = vrot.slane %v1093_v32, 1 }
 0x4b9   : > { %v1095_v56 = vadd.f32 %v1094_v55, %v1093_v32 }
 0x4bb   : > { %1595 = vpush %v1095_v56 }
 0x4bc   : > { %1597 = vpush %v1118_v5 }
 0x4c1   : > { %v1266_v2 = vpop.xlane.xlu0 %1265 }
 0x4c2   : > { %v1267_v6 = vrot.slane %v1266_v2, 4 }
 0x4c4   : > { %v1268_v35 = vadd.f32 %v1267_v6, %v1266_v2 }
 0x4c5   : > { %v1289_v43 = vpop.xlane.xlu0 %1288 }
 0x4c6   : > { %v1269_v13 = vrot.slane %v1268_v35, 2  ;;  %v1290_v38 = vrot.slane %v1289_v43, 4 }
 0x4c8   : > { %v1291_v39 = vadd.f32 %v1290_v38, %v1289_v43  ;;  %v1270_v3 = vadd.f32 %v1269_v13, %v1268_v35 }
 0x4ca   : > { %v1292_v34 = vrot.slane %v1291_v39, 2  ;;  %v1271_v47 = vrot.slane %v1270_v3, 1 }
 0x4cc   : > { %v1293_v9 = vadd.f32 %v1292_v34, %v1291_v39  ;;  %v1272_v41 = vadd.f32 %v1271_v47, %v1270_v3 }
 0x4ce   : > { %1599 = vpush %v1272_v41  ;;  %v1294_v37 = vrot.slane %v1293_v9, 1 }
 0x4d0   : > { %v1295_v45 = vadd.f32 %v1294_v37, %v1293_v9 }
 0x4d2   : > { %1601 = vpush %v1295_v45 }
 0x4ec   : > { %s1596_s7 = spop %1595 }
 0x4ed   : > { %v1298_v15 = vstv %s1596_s7  ;;  %s1598_s25 = spop %1597 }
 0x4ee   : > { %v1299_v46 = vsel %vm1297_vm0, %v1298_v15, 0.0  ;;  %v1301_v48 = vstv %s1598_s25 }
 0x4ef   : > { %v1302_v52 = vsel %vm1300_vm5, %v1301_v48, %v1299_v46 }
 0x4ff   : > { %s1600_s27 = spop %1599 }
 0x500   : > { %v1304_v49 = vstv %s1600_s27 }
 0x501   : > { %v1305_v53 = vsel %vm1303_vm6, %v1304_v49, %v1302_v52 }
 0x503   : > { %s1602_s30 = spop %1601 }
 0x504   : > { %v1307_v54 = vstv %s1602_s30 }
 0x505   : > { %v1308_v44 = vsel %vm1306_vm7, %v1307_v54, %v1305_v53 }
 0x506   : > { %1309 = vst [vmem:[%s631_s5] sm:$0xff] %v1308_v44 }
 0x507   : > { %2116 = shalt.err (!%p2113_p12)
}
 0x508   : > { %s2117_s13 = scalar_lea.hbm %s2931_s1, 128  ;;  %s2121_s3 = scalar_lea.hbm %s3064_s26, 256 }
 0x509   : > { %p2118_p11 = scmp.ne.s32.totalorder %s2931_s1, %s2117_s13  ;;  %p2122_p9 = scmp.lt.u32.totalorder %s2931_s1, %s3064_s26 }
 0x50a   : > { %p2123_p0 = scmp.lt.u32.totalorder %s2121_s3, %s2117_s13  ;;  %p2125_p7 = scmp.lt.u32.totalorder %s2117_s13, %s2931_s1 }
 0x50b   : > { %p2119_p5 = pnand %p2118_p11, %p3065_p10 }
 0x50c   : > { %p2124_p2 = por %p2123_p0, %p2122_p9 }
 0x50d   : > { %p2120_p3 = pneg %p2119_p5 }
 0x50e   : > { %p2126_p1 = por %p2125_p7, %p2124_p2 }
 0x510   : > { %p2127_p6 = pnand %p2126_p1, %p2120_p3 }
 0x512   : > { %2130 = shalt.err (!%p2127_p6)
}
 0x513   : > { %1637 = dma.vmem_to_hbm [thread:$0]  (%p3065_p10), %s2933_s22, 128, %s2931_s1, %s1311_s28  }
 0x514 PF: > { %s3066_s25 = sld [smem:[#allocation28_spill]]  ;;  %s3067_s27 = sld [smem:[#allocation34_spill]] }
 0x515   : > { %p3069_p13 = scmp.ge.s32.totalorder %s2189_s20, 2 }
 0x51a   : > { %s1336_s9 = sand.u32 1, %s3066_s25   ;;  %p3068_p8 = scmp.ne.s32.totalorder %s3067_s27, 0 }
 0x51b   : > { %s1337_s5 = scalar_lea.sflag [#allocation4], %s1336_s9 }
 0x51c   : > { %p1675_p4 = pnand %p3069_p13, %p3068_p8 }
 0x51e   : > { %2172 = dma.done.wait (!%p1675_p4), %s1337_s5, 128  }
 0x51f   : > { %2174 = vsyncadd (!%p1675_p4), %s1337_s5, 4294967168  ;;  %s3070_s20 = sld [smem:[#allocation30_spill]]  ;;  %s3071_s30 = sld [smem:[#allocation31_spill]] }
 0x520   : > { %s3072_s17 = smov %s2181_s18  ;;  %s3073_s18 = smov %s2185_s19 }
 0x525   : > { %p33_p12 = scmp.ge.s32.totalorder %s3070_s20, 4   ;;  %s3074_s19 = smov %s3071_s30 }
 0x527   :  { %35 = sbr.rel (!%p33_p12) target bundleno = 19 (0x13), region = 181 }
 0x52e   :  { %1342 = vsyncpa [#allocation3], 1 }
 0x52f   :  { %1344 = vsyncpa [#allocation3 + $0x1], 1 }
 0x530   :  { %1345 = vsyncpa [#allocation6], 1 }
 0x531   :  { %1347 = vsyncpa [#allocation6 + $0x1], 1 }
 0x532   :  { %1348 = vsyncpa [#allocation9], 1 }
 0x533   :  { %1350 = vsyncpa [#allocation9 + $0x1], 1 }
 0x534   :  { %1351 = vsyncpa [#allocation12], 1 }
 0x535   :  { %1352 = vsyncpa [#allocation15], 1 }
 0x536   :  { %1353 = vsyncpa [#allocation18], 1 }
 0x537   :  { %1354 = vsyncpa [#allocation4], 1 }
 0x538   :  { %1356 = vsyncpa [#allocation4 + $0x1], 1 }

</bundles_post_ra>
